<compile_context>
chip_gen: v7x
topology: tpu7x:2x2x1
jax: 0.10.0
libtpu: 0.0.40
codegen_flags: <defaults>
</compile_context>

<pallas_src>
import functools
import math

import jax
import jax.numpy as jnp
from jax.experimental import pallas as pl
from jax.experimental.pallas import tpu as pltpu

# ----------------------------------------------------------------------------
# Small, self-consistent configuration.
# ----------------------------------------------------------------------------
INPUT_SIZE = 1
OUTPUT_SIZE = 1
D_MODEL = 8       # must equal N_HEADS (see NOTE above)
N_HEADS = 8
D_FF = 32
E_LAYERS = 2      # encoder depth in the reference (elided: its output is unused)
D_LAYERS = 1
SEQ_LEN = 16      # encoder length (input accepted, never consumed)
LABEL_LEN = 4
PRED_LEN = 4
DEC_LEN = LABEL_LEN + PRED_LEN
BATCH = 2
MA_KERNEL = 25    # SeriesDecomp kernel_size
LN_EPS = 1e-5     # torch.nn.LayerNorm default eps


# ----------------------------------------------------------------------------
# In-kernel helpers (pure jnp, traced inside the Pallas kernel body).
# ----------------------------------------------------------------------------
def _erf(x):
    # float32-accurate erf (Abramowitz & Stegun 7.1.26, |err| <= 1.5e-7).
    # TODO(synk): lax.erf Mosaic lowering availability varies across versions;
    # this rational approximation matches torch's exact GELU to f32 precision.
    a1, a2, a3, a4, a5 = (0.254829592, -0.284496736, 1.421413741,
                          -1.453152027, 1.061405429)
    p = 0.3275911
    z = jnp.abs(x)
    t = 1.0 / (1.0 + p * z)
    poly = ((((a5 * t + a4) * t + a3) * t + a2) * t + a1) * t
    y = 1.0 - poly * jnp.exp(-z * z)
    return jnp.where(x >= 0, y, -y)


def _gelu(x):
    # torch.nn.functional.gelu default = exact (erf) form.
    return 0.5 * x * (1.0 + _erf(x * (1.0 / math.sqrt(2.0))))


def _layernorm(x, g, b):
    mu = jnp.mean(x, axis=-1, keepdims=True)
    var = jnp.mean(jnp.square(x - mu), axis=-1, keepdims=True)
    return (x - mu) * jax.lax.rsqrt(var + LN_EPS) * g + b


# ----------------------------------------------------------------------------
# The single fused kernel: decoder embedding -> D_LAYERS AutoCorrelationBlocks
# -> projection.  One invocation; all weights and activations VMEM-resident.
# ----------------------------------------------------------------------------
def _decoder_kernel(xd_ref, avg_ref, emb_w_ref, emb_b_ref,
                    wqv_ref, wk_ref, wot_ref,
                    g1_ref, b1_ref, g2_ref, b2_ref,
                    w1t_ref, w2t_ref, pw_ref, pb_ref,
                    out_ref, *, batch, length, n_layers):
    inv_sqrt_dk = 1.0 / math.sqrt(D_MODEL // N_HEADS)
    avg = avg_ref[...]                                   # (N, N) block-diag AvgPool1d(25,1,12)

    # dec_embedding: Linear(1 -> D) on flattened (N = B*L) rows.
    x = xd_ref[...] * emb_w_ref[...] + emb_b_ref[...]    # (N, D)

    for l in range(n_layers):
        wqv = wqv_ref[l]      # (D, 2H): [Wq^T | Wv^T] fused
        wk = wk_ref[l]        # (H, D):  Wk (torch layout)
        wot = wot_ref[l]      # (H, D):  Wo^T
        g1, b1 = g1_ref[l], b1_ref[l]
        g2, b2 = g2_ref[l], b2_ref[l]

        # ---- SeriesDecomp #1: AvgPool1d(25,1,12) as a block-diag matmul ----
        trend1 = jnp.dot(avg, x, preferred_element_type=jnp.float32)
        s1 = x - trend1

        # ---- AutoCorrelation attention, per batch block (d_k = d_v = 1) ----
        nx_blocks = []
        for b in range(batch):
            s1b = s1[b * length:(b + 1) * length, :]                       # (L, D)
            qv = jnp.dot(s1b, wqv, preferred_element_type=jnp.float32)     # (L, 2H)
            q = qv[:, :N_HEADS]                                            # (L, H)
            v = qv[:, N_HEADS:]                                            # (L, H)
            # K^T directly as (H, L): contract the shared D axis (NT matmul).
            kT = jax.lax.dot_general(wk, s1b, (((1,), (1,)), ((), ())),
                                     preferred_element_type=jnp.float32)   # (H, L)
            # scores with the softmax (keys) axis on lanes:
            #   sc[i, h, j] = q[i, h] * k[j, h] / sqrt(d_k)
            sc = q[:, :, None] * kT[None, :, :] * inv_sqrt_dk              # (L, H, L)
            m = jnp.max(sc, axis=-1, keepdims=True)                        # lane reduce
            e = jnp.exp(sc - m)
            den = jnp.sum(e, axis=-1, keepdims=True)                       # lane reduce
            corr = e / den                                                 # exact softmax
            # time_delay_agg (inference): agg[h, j] = sum_i corr[i,h,j] * v[i,h]
            agg = jnp.sum(corr * v[:, :, None], axis=0)                    # (H, L)
            # W_o: new_x[j, d] = sum_h agg[h, j] * Wo^T[h, d].  H = 8, so this
            # tiny contraction stays on the VPU (an MXU matmul would be >90% idle).
            nx_blocks.append(jnp.sum(agg[:, :, None] * wot[:, None, :], axis=0))  # (L, D)
        new_x = jnp.concatenate(nx_blocks, axis=0)                         # (N, D)

        # ---- AutoCorrelationLayer (dropout == identity in eval mode) ----
        x1 = _layernorm(s1 + new_x, g1, b1)       # norm1
        x2 = _layernorm(x1, g2, b2)               # norm2 (pre-FFN, as in reference)
        hid = _gelu(jnp.dot(x2, w1t_ref[l], preferred_element_type=jnp.float32))  # (N, F)
        y = jnp.dot(hid, w2t_ref[l], preferred_element_type=jnp.float32)          # (N, D)
        s2 = _layernorm(x2 + y, g2, b2)           # norm2 again (as in reference)

        # ---- SeriesDecomp #2 + combine (explicit to match reference fp order) ----
        trend2 = jnp.dot(avg, s2, preferred_element_type=jnp.float32)
        x = trend1 + trend2 + (s2 - trend2)

    # ---- projection: Linear(D -> 1), emitted lane-dense as a (1, N) row ----
    proj = jax.lax.dot_general(pw_ref[...], x, (((1,), (1,)), ((), ())),
                               preferred_element_type=jnp.float32) + pb_ref[...]
    out_ref[...] = proj.astype(out_ref.dtype)


# ----------------------------------------------------------------------------
# Host-side structural operator: block-diagonal moving average over batch.
# ----------------------------------------------------------------------------
def _flat_moving_avg(batch, length, kernel_size):
    """(B*L, B*L): AvgPool1d(k, stride=1, pad=k//2, count_include_pad=True)
    per batch element, zero across batch blocks."""
    half = kernel_size // 2
    idx = jnp.arange(batch * length)
    b = idx // length
    p = idx % length
    same_batch = b[:, None] == b[None, :]
    in_band = jnp.abs(p[:, None] - p[None, :]) <= half
    return (same_batch & in_band).astype(jnp.float32) / float(kernel_size)


def _const_spec(shape):
    zeros = (0,) * len(shape)
    return pl.BlockSpec(shape, lambda i, _z=zeros: _z)


# ----------------------------------------------------------------------------
# Parameter setup (deterministic, in-script).  Only the parameters that affect
# the returned dec_out are materialized (the reference's encoder stack never
# contributes to the output).  Weights are pre-transposed / pre-fused on host.
# ----------------------------------------------------------------------------
def init_params(key):
    s = 0.1
    n = D_LAYERS
    ks = jax.random.split(key, 3 + 6 * n)
    wq, wk, wv, wo, w1, w2 = [], [], [], [], [], []
    for li in range(n):
        base = 3 + 6 * li
        wq.append(jax.random.normal(ks[base + 0], (N_HEADS, D_MODEL), jnp.float32) * s)  # W_q.weight
        wk.append(jax.random.normal(ks[base + 1], (N_HEADS, D_MODEL), jnp.float32) * s)  # W_k.weight
        wv.append(jax.random.normal(ks[base + 2], (N_HEADS, D_MODEL), jnp.float32) * s)  # W_v.weight
        wo.append(jax.random.normal(ks[base + 3], (D_MODEL, N_HEADS), jnp.float32) * s)  # W_o.weight
        w1.append(jax.random.normal(ks[base + 4], (D_FF, D_MODEL), jnp.float32) * s)     # conv1 (F,D,1)
        w2.append(jax.random.normal(ks[base + 5], (D_MODEL, D_FF), jnp.float32) * s)     # conv2 (D,F,1)
    wqv_t = jnp.stack([jnp.concatenate([q.T, v.T], axis=1) for q, v in zip(wq, wv)])  # (n, D, 2H)
    return dict(
        dec_emb_w=(jax.random.normal(ks[0], (D_MODEL, INPUT_SIZE), jnp.float32) * s).T,  # (1, D)
        dec_emb_b=jnp.zeros((1, D_MODEL), jnp.float32),
        proj_w=jax.random.normal(ks[1], (OUTPUT_SIZE, D_MODEL), jnp.float32) * s,        # (1, D)
        proj_b=jnp.zeros((1, 1), jnp.float32),
        wqv_t=wqv_t,                                   # (n, D, 2H): [Wq^T | Wv^T]
        wk=jnp.stack(wk),                              # (n, H, D)
        wo_t=jnp.stack([w.T for w in wo]),             # (n, H, D)
        w1_t=jnp.stack([w.T for w in w1]),             # (n, D, F)
        w2_t=jnp.stack([w.T for w in w2]),             # (n, F, D)
        g1=jnp.ones((n, 1, D_MODEL), jnp.float32),
        b1=jnp.zeros((n, 1, D_MODEL), jnp.float32),
        g2=jnp.ones((n, 1, D_MODEL), jnp.float32),
        b2=jnp.zeros((n, 1, D_MODEL), jnp.float32),
    )


# ----------------------------------------------------------------------------
# Model forward: ONE pallas_call.  The encoder stack of the reference forward
# is elided because its output is neither returned nor consumed by the decoder
# (dec_out is numerically identical); x_enc / marks / masks are accepted and
# ignored exactly like the reference.
# ----------------------------------------------------------------------------
def autoformer_forward(params, x_enc, x_mark_enc, x_dec, x_mark_dec,
                       enc_self_mask=None, dec_self_mask=None, dec_enc_mask=None):
    del x_enc, x_mark_enc, x_mark_dec, enc_self_mask, dec_self_mask, dec_enc_mask
    B, Ld, _ = x_dec.shape
    ND = B * Ld

    xd = x_dec.reshape(ND, INPUT_SIZE).astype(jnp.float32)
    avg = _flat_moving_avg(B, Ld, MA_KERNEL)

    operands = (xd, avg,
                params["dec_emb_w"], params["dec_emb_b"],
                params["wqv_t"], params["wk"], params["wo_t"],
                params["g1"], params["b1"], params["g2"], params["b2"],
                params["w1_t"], params["w2_t"],
                params["proj_w"], params["proj_b"])

    kernel = functools.partial(_decoder_kernel, batch=B, length=Ld,
                               n_layers=int(params["wqv_t"].shape[0]))

    out_row = pl.pallas_call(
        kernel,
        out_shape=jax.ShapeDtypeStruct((1, ND), jnp.float32),
        grid=(1,),
        in_specs=[_const_spec(op.shape) for op in operands],
        out_specs=_const_spec((1, ND)),
        compiler_params=pltpu.CompilerParams(dimension_semantics=("arbitrary",)),
    )(*operands)

    return out_row.reshape(B, Ld, OUTPUT_SIZE), None


if __name__ == "__main__":
    key = jax.random.PRNGKey(0)
    k_enc, k_dec, k_par = jax.random.split(key, 3)
    x_enc = jax.random.normal(k_enc, (BATCH, SEQ_LEN, INPUT_SIZE), jnp.float32)
    x_dec = jax.random.normal(k_dec, (BATCH, DEC_LEN, INPUT_SIZE), jnp.float32)
    x_mark_enc = jnp.zeros((BATCH, SEQ_LEN, INPUT_SIZE), jnp.float32)
    x_mark_dec = jnp.zeros((BATCH, DEC_LEN, INPUT_SIZE), jnp.float32)

    params = init_params(k_par)
    fwd = jax.jit(autoformer_forward)
    out, attn = fwd(params, x_enc, x_mark_enc, x_dec, x_mark_dec)
    out = jax.block_until_ready(out)

    assert out.shape == (BATCH, DEC_LEN, OUTPUT_SIZE), out.shape
    assert attn is None
    assert bool(jnp.all(jnp.isfinite(out)))
    print("KERNEL_OK")
</pallas_src>

<mosaic_0001>
module attributes {stable_mosaic.version = 11 : i64} {
  func.func @_decoder_kernel(%arg0: i32, %arg1: memref<16x1xf32, #tpu.memory_space<vmem>>, %arg2: memref<16x16xf32, #tpu.memory_space<vmem>>, %arg3: memref<1x8xf32, #tpu.memory_space<vmem>>, %arg4: memref<1x8xf32, #tpu.memory_space<vmem>>, %arg5: memref<1x8x16xf32, #tpu.memory_space<vmem>>, %arg6: memref<1x8x8xf32, #tpu.memory_space<vmem>>, %arg7: memref<1x8x8xf32, #tpu.memory_space<vmem>>, %arg8: memref<1x1x8xf32, #tpu.memory_space<vmem>>, %arg9: memref<1x1x8xf32, #tpu.memory_space<vmem>>, %arg10: memref<1x1x8xf32, #tpu.memory_space<vmem>>, %arg11: memref<1x1x8xf32, #tpu.memory_space<vmem>>, %arg12: memref<1x8x32xf32, #tpu.memory_space<vmem>>, %arg13: memref<1x32x8xf32, #tpu.memory_space<vmem>>, %arg14: memref<1x8xf32, #tpu.memory_space<vmem>>, %arg15: memref<1x1xf32, #tpu.memory_space<vmem>>, %arg16: memref<1x16xf32, #tpu.memory_space<vmem>>) attributes {dimension_semantics = [#tpu.dimension_semantics<arbitrary>], iteration_bounds = array<i64: 1>, scalar_prefetch = 0 : i64, scratch_operands = 0 : i64, tpu.core_type = #tpu.core_type<tc>, window_params = [{pipeline_mode = #tpu.pipeline_mode<synchronous>, transform_indices = @transform_0, window_bounds = array<i64: 16, 1>}, {pipeline_mode = #tpu.pipeline_mode<synchronous>, transform_indices = @transform_1, window_bounds = array<i64: 16, 16>}, {pipeline_mode = #tpu.pipeline_mode<synchronous>, transform_indices = @transform_2, window_bounds = array<i64: 1, 8>}, {pipeline_mode = #tpu.pipeline_mode<synchronous>, transform_indices = @transform_3, window_bounds = array<i64: 1, 8>}, {pipeline_mode = #tpu.pipeline_mode<synchronous>, transform_indices = @transform_4, window_bounds = array<i64: 1, 8, 16>}, {pipeline_mode = #tpu.pipeline_mode<synchronous>, transform_indices = @transform_5, window_bounds = array<i64: 1, 8, 8>}, {pipeline_mode = #tpu.pipeline_mode<synchronous>, transform_indices = @transform_6, window_bounds = array<i64: 1, 8, 8>}, {pipeline_mode = #tpu.pipeline_mode<synchronous>, transform_indices = @transform_7, window_bounds = array<i64: 1, 1, 8>}, {pipeline_mode = #tpu.pipeline_mode<synchronous>, transform_indices = @transform_8, window_bounds = array<i64: 1, 1, 8>}, {pipeline_mode = #tpu.pipeline_mode<synchronous>, transform_indices = @transform_9, window_bounds = array<i64: 1, 1, 8>}, {pipeline_mode = #tpu.pipeline_mode<synchronous>, transform_indices = @transform_10, window_bounds = array<i64: 1, 1, 8>}, {pipeline_mode = #tpu.pipeline_mode<synchronous>, transform_indices = @transform_11, window_bounds = array<i64: 1, 8, 32>}, {pipeline_mode = #tpu.pipeline_mode<synchronous>, transform_indices = @transform_12, window_bounds = array<i64: 1, 32, 8>}, {pipeline_mode = #tpu.pipeline_mode<synchronous>, transform_indices = @transform_13, window_bounds = array<i64: 1, 8>}, {pipeline_mode = #tpu.pipeline_mode<synchronous>, transform_indices = @transform_14, window_bounds = array<i64: 1, 1>}, {pipeline_mode = #tpu.pipeline_mode<synchronous>, transform_indices = @transform_15, window_bounds = array<i64: 1, 16>}]} {
    %c0 = arith.constant 0 : index
    %c0_0 = arith.constant 0 : index
    %0 = vector.load %arg2[%c0, %c0_0] : memref<16x16xf32, #tpu.memory_space<vmem>>, vector<16x16xf32>
    %c0_1 = arith.constant 0 : index
    %c0_2 = arith.constant 0 : index
    %1 = vector.load %arg1[%c0_1, %c0_2] : memref<16x1xf32, #tpu.memory_space<vmem>>, vector<16x1xf32>
    %c0_3 = arith.constant 0 : index
    %c0_4 = arith.constant 0 : index
    %2 = vector.load %arg3[%c0_3, %c0_4] : memref<1x8xf32, #tpu.memory_space<vmem>>, vector<1x8xf32>
    %3 = vector.broadcast %1 : vector<16x1xf32> to vector<16x8xf32>
    %4 = vector.broadcast %2 : vector<1x8xf32> to vector<16x8xf32>
    %5 = arith.mulf %3, %4 : vector<16x8xf32>
    %c0_5 = arith.constant 0 : index
    %c0_6 = arith.constant 0 : index
    %6 = vector.load %arg4[%c0_5, %c0_6] : memref<1x8xf32, #tpu.memory_space<vmem>>, vector<1x8xf32>
    %7 = vector.broadcast %6 : vector<1x8xf32> to vector<16x8xf32>
    %8 = arith.addf %5, %7 : vector<16x8xf32>
    %c0_7 = arith.constant 0 : index
    %c0_8 = arith.constant 0 : index
    %c0_9 = arith.constant 0 : index
    %9 = vector.load %arg5[%c0_7, %c0_8, %c0_9] : memref<1x8x16xf32, #tpu.memory_space<vmem>>, vector<1x8x16xf32>
    %10 = vector.shape_cast %9 : vector<1x8x16xf32> to vector<8x16xf32>
    %c0_10 = arith.constant 0 : index
    %c0_11 = arith.constant 0 : index
    %c0_12 = arith.constant 0 : index
    %11 = vector.load %arg6[%c0_10, %c0_11, %c0_12] : memref<1x8x8xf32, #tpu.memory_space<vmem>>, vector<1x8x8xf32>
    %12 = vector.shape_cast %11 : vector<1x8x8xf32> to vector<8x8xf32>
    %c0_13 = arith.constant 0 : index
    %c0_14 = arith.constant 0 : index
    %c0_15 = arith.constant 0 : index
    %13 = vector.load %arg7[%c0_13, %c0_14, %c0_15] : memref<1x8x8xf32, #tpu.memory_space<vmem>>, vector<1x8x8xf32>
    %14 = vector.shape_cast %13 : vector<1x8x8xf32> to vector<8x8xf32>
    %c0_16 = arith.constant 0 : index
    %c0_17 = arith.constant 0 : index
    %c0_18 = arith.constant 0 : index
    %15 = vector.load %arg8[%c0_16, %c0_17, %c0_18] : memref<1x1x8xf32, #tpu.memory_space<vmem>>, vector<1x1x8xf32>
    %16 = vector.shape_cast %15 : vector<1x1x8xf32> to vector<1x8xf32>
    %c0_19 = arith.constant 0 : index
    %c0_20 = arith.constant 0 : index
    %c0_21 = arith.constant 0 : index
    %17 = vector.load %arg9[%c0_19, %c0_20, %c0_21] : memref<1x1x8xf32, #tpu.memory_space<vmem>>, vector<1x1x8xf32>
    %18 = vector.shape_cast %17 : vector<1x1x8xf32> to vector<1x8xf32>
    %c0_22 = arith.constant 0 : index
    %c0_23 = arith.constant 0 : index
    %c0_24 = arith.constant 0 : index
    %19 = vector.load %arg10[%c0_22, %c0_23, %c0_24] : memref<1x1x8xf32, #tpu.memory_space<vmem>>, vector<1x1x8xf32>
    %20 = vector.shape_cast %19 : vector<1x1x8xf32> to vector<1x8xf32>
    %c0_25 = arith.constant 0 : index
    %c0_26 = arith.constant 0 : index
    %c0_27 = arith.constant 0 : index
    %21 = vector.load %arg11[%c0_25, %c0_26, %c0_27] : memref<1x1x8xf32, #tpu.memory_space<vmem>>, vector<1x1x8xf32>
    %22 = vector.shape_cast %21 : vector<1x1x8xf32> to vector<1x8xf32>
    %cst = arith.constant dense<0.000000e+00> : vector<16x8xf32>
    %23 = tpu.matmul %0, %8, %cst {dimension_numbers = #tpu.dot_dimension_numbers<[1], [0], [0], [1], [0, 0, 1, 1], [], []>} : vector<16x16xf32>, vector<16x8xf32>, vector<16x8xf32> -> vector<16x8xf32>
    %24 = arith.subf %8, %23 : vector<16x8xf32>
    %25 = vector.extract_strided_slice %24 {offsets = [0, 0], sizes = [8, 8], strides = [1, 1]} : vector<16x8xf32> to vector<8x8xf32>
    %cst_28 = arith.constant dense<0.000000e+00> : vector<8x16xf32>
    %26 = tpu.matmul %25, %10, %cst_28 {dimension_numbers = #tpu.dot_dimension_numbers<[1], [0], [0], [1], [0, 0, 1, 1], [], []>} : vector<8x8xf32>, vector<8x16xf32>, vector<8x16xf32> -> vector<8x16xf32>
    %27 = vector.extract_strided_slice %26 {offsets = [0, 0], sizes = [8, 8], strides = [1, 1]} : vector<8x16xf32> to vector<8x8xf32>
    %28 = vector.extract_strided_slice %26 {offsets = [0, 8], sizes = [8, 8], strides = [1, 1]} : vector<8x16xf32> to vector<8x8xf32>
    %cst_29 = arith.constant dense<0.000000e+00> : vector<8x8xf32>
    %29 = tpu.matmul %12, %25, %cst_29 {dimension_numbers = #tpu.dot_dimension_numbers<[1], [1], [0], [0], [0, 0, 1, 0], [], []>} : vector<8x8xf32>, vector<8x8xf32>, vector<8x8xf32> -> vector<8x8xf32>
    %30 = vector.shape_cast %27 : vector<8x8xf32> to vector<8x8x1xf32>
    %31 = vector.shape_cast %29 : vector<8x8xf32> to vector<1x8x8xf32>
    %32 = vector.broadcast %30 : vector<8x8x1xf32> to vector<8x8x8xf32>
    %33 = vector.broadcast %31 : vector<1x8x8xf32> to vector<8x8x8xf32>
    %34 = arith.mulf %32, %33 : vector<8x8x8xf32>
    %cst_30 = arith.constant 1.000000e+00 : f32
    %35 = vector.broadcast %cst_30 : f32 to vector<8x8x8xf32>
    %36 = arith.mulf %34, %35 : vector<8x8x8xf32>
    %cst_31 = arith.constant dense<0xFF800000> : vector<8x8xf32>
    %37 = vector.multi_reduction <maximumf>, %36, %cst_31 [2] : vector<8x8x8xf32> to vector<8x8xf32>
    %38 = vector.shape_cast %37 : vector<8x8xf32> to vector<8x8x1xf32>
    %39 = vector.broadcast %38 : vector<8x8x1xf32> to vector<8x8x8xf32>
    %40 = arith.subf %36, %39 : vector<8x8x8xf32>
    %41 = math.exp %40 : vector<8x8x8xf32>
    %cst_32 = arith.constant dense<0.000000e+00> : vector<8x8xf32>
    %42 = vector.multi_reduction <add>, %41, %cst_32 [2] : vector<8x8x8xf32> to vector<8x8xf32>
    %43 = vector.shape_cast %42 : vector<8x8xf32> to vector<8x8x1xf32>
    %44 = vector.broadcast %43 : vector<8x8x1xf32> to vector<8x8x8xf32>
    %45 = arith.divf %41, %44 : vector<8x8x8xf32>
    %46 = vector.shape_cast %28 : vector<8x8xf32> to vector<8x8x1xf32>
    %47 = vector.broadcast %46 : vector<8x8x1xf32> to vector<8x8x8xf32>
    %48 = arith.mulf %45, %47 : vector<8x8x8xf32>
    %cst_33 = arith.constant dense<0.000000e+00> : vector<8x8xf32>
    %49 = vector.multi_reduction <add>, %48, %cst_33 [0] : vector<8x8x8xf32> to vector<8x8xf32>
    %50 = vector.shape_cast %49 : vector<8x8xf32> to vector<8x8x1xf32>
    %51 = vector.shape_cast %14 : vector<8x8xf32> to vector<8x1x8xf32>
    %52 = vector.broadcast %50 : vector<8x8x1xf32> to vector<8x8x8xf32>
    %53 = vector.broadcast %51 : vector<8x1x8xf32> to vector<8x8x8xf32>
    %54 = arith.mulf %52, %53 : vector<8x8x8xf32>
    %cst_34 = arith.constant dense<0.000000e+00> : vector<8x8xf32>
    %55 = vector.multi_reduction <add>, %54, %cst_34 [0] : vector<8x8x8xf32> to vector<8x8xf32>
    %56 = vector.extract_strided_slice %24 {offsets = [8, 0], sizes = [8, 8], strides = [1, 1]} : vector<16x8xf32> to vector<8x8xf32>
    %cst_35 = arith.constant dense<0.000000e+00> : vector<8x16xf32>
    %57 = tpu.matmul %56, %10, %cst_35 {dimension_numbers = #tpu.dot_dimension_numbers<[1], [0], [0], [1], [0, 0, 1, 1], [], []>} : vector<8x8xf32>, vector<8x16xf32>, vector<8x16xf32> -> vector<8x16xf32>
    %58 = vector.extract_strided_slice %57 {offsets = [0, 0], sizes = [8, 8], strides = [1, 1]} : vector<8x16xf32> to vector<8x8xf32>
    %59 = vector.extract_strided_slice %57 {offsets = [0, 8], sizes = [8, 8], strides = [1, 1]} : vector<8x16xf32> to vector<8x8xf32>
    %cst_36 = arith.constant dense<0.000000e+00> : vector<8x8xf32>
    %60 = tpu.matmul %12, %56, %cst_36 {dimension_numbers = #tpu.dot_dimension_numbers<[1], [1], [0], [0], [0, 0, 1, 0], [], []>} : vector<8x8xf32>, vector<8x8xf32>, vector<8x8xf32> -> vector<8x8xf32>
    %61 = vector.shape_cast %58 : vector<8x8xf32> to vector<8x8x1xf32>
    %62 = vector.shape_cast %60 : vector<8x8xf32> to vector<1x8x8xf32>
    %63 = vector.broadcast %61 : vector<8x8x1xf32> to vector<8x8x8xf32>
    %64 = vector.broadcast %62 : vector<1x8x8xf32> to vector<8x8x8xf32>
    %65 = arith.mulf %63, %64 : vector<8x8x8xf32>
    %cst_37 = arith.constant 1.000000e+00 : f32
    %66 = vector.broadcast %cst_37 : f32 to vector<8x8x8xf32>
    %67 = arith.mulf %65, %66 : vector<8x8x8xf32>
    %cst_38 = arith.constant dense<0xFF800000> : vector<8x8xf32>
    %68 = vector.multi_reduction <maximumf>, %67, %cst_38 [2] : vector<8x8x8xf32> to vector<8x8xf32>
    %69 = vector.shape_cast %68 : vector<8x8xf32> to vector<8x8x1xf32>
    %70 = vector.broadcast %69 : vector<8x8x1xf32> to vector<8x8x8xf32>
    %71 = arith.subf %67, %70 : vector<8x8x8xf32>
    %72 = math.exp %71 : vector<8x8x8xf32>
    %cst_39 = arith.constant dense<0.000000e+00> : vector<8x8xf32>
    %73 = vector.multi_reduction <add>, %72, %cst_39 [2] : vector<8x8x8xf32> to vector<8x8xf32>
    %74 = vector.shape_cast %73 : vector<8x8xf32> to vector<8x8x1xf32>
    %75 = vector.broadcast %74 : vector<8x8x1xf32> to vector<8x8x8xf32>
    %76 = arith.divf %72, %75 : vector<8x8x8xf32>
    %77 = vector.shape_cast %59 : vector<8x8xf32> to vector<8x8x1xf32>
    %78 = vector.broadcast %77 : vector<8x8x1xf32> to vector<8x8x8xf32>
    %79 = arith.mulf %76, %78 : vector<8x8x8xf32>
    %cst_40 = arith.constant dense<0.000000e+00> : vector<8x8xf32>
    %80 = vector.multi_reduction <add>, %79, %cst_40 [0] : vector<8x8x8xf32> to vector<8x8xf32>
    %81 = vector.shape_cast %80 : vector<8x8xf32> to vector<8x8x1xf32>
    %82 = vector.shape_cast %14 : vector<8x8xf32> to vector<8x1x8xf32>
    %83 = vector.broadcast %81 : vector<8x8x1xf32> to vector<8x8x8xf32>
    %84 = vector.broadcast %82 : vector<8x1x8xf32> to vector<8x8x8xf32>
    %85 = arith.mulf %83, %84 : vector<8x8x8xf32>
    %cst_41 = arith.constant dense<0.000000e+00> : vector<8x8xf32>
    %86 = vector.multi_reduction <add>, %85, %cst_41 [0] : vector<8x8x8xf32> to vector<8x8xf32>
    %87 = tpu.concatenate %55, %86 in 0 : vector<8x8xf32>, vector<8x8xf32> -> vector<16x8xf32>
    %88 = arith.addf %24, %87 : vector<16x8xf32>
    %cst_42 = arith.constant dense<0.000000e+00> : vector<16xf32>
    %89 = vector.multi_reduction <add>, %88, %cst_42 [1] : vector<16x8xf32> to vector<16xf32>
    %90 = vector.shape_cast %89 : vector<16xf32> to vector<16x1xf32>
    %cst_43 = arith.constant 8.000000e+00 : f32
    %91 = vector.broadcast %cst_43 : f32 to vector<16x1xf32>
    %92 = arith.divf %90, %91 : vector<16x1xf32>
    %93 = vector.broadcast %92 : vector<16x1xf32> to vector<16x8xf32>
    %94 = arith.subf %88, %93 : vector<16x8xf32>
    %95 = arith.mulf %94, %94 : vector<16x8xf32>
    %cst_44 = arith.constant dense<0.000000e+00> : vector<16xf32>
    %96 = vector.multi_reduction <add>, %95, %cst_44 [1] : vector<16x8xf32> to vector<16xf32>
    %97 = vector.shape_cast %96 : vector<16xf32> to vector<16x1xf32>
    %cst_45 = arith.constant 8.000000e+00 : f32
    %98 = vector.broadcast %cst_45 : f32 to vector<16x1xf32>
    %99 = arith.divf %97, %98 : vector<16x1xf32>
    %100 = vector.broadcast %92 : vector<16x1xf32> to vector<16x8xf32>
    %101 = arith.subf %88, %100 : vector<16x8xf32>
    %cst_46 = arith.constant 9.99999974E-6 : f32
    %102 = vector.broadcast %cst_46 : f32 to vector<16x1xf32>
    %103 = arith.addf %99, %102 : vector<16x1xf32>
    %104 = math.rsqrt %103 : vector<16x1xf32>
    %105 = vector.broadcast %104 : vector<16x1xf32> to vector<16x8xf32>
    %106 = arith.mulf %101, %105 : vector<16x8xf32>
    %107 = vector.broadcast %16 : vector<1x8xf32> to vector<16x8xf32>
    %108 = arith.mulf %106, %107 : vector<16x8xf32>
    %109 = vector.broadcast %18 : vector<1x8xf32> to vector<16x8xf32>
    %110 = arith.addf %108, %109 : vector<16x8xf32>
    %cst_47 = arith.constant dense<0.000000e+00> : vector<16xf32>
    %111 = vector.multi_reduction <add>, %110, %cst_47 [1] : vector<16x8xf32> to vector<16xf32>
    %112 = vector.shape_cast %111 : vector<16xf32> to vector<16x1xf32>
    %cst_48 = arith.constant 8.000000e+00 : f32
    %113 = vector.broadcast %cst_48 : f32 to vector<16x1xf32>
    %114 = arith.divf %112, %113 : vector<16x1xf32>
    %115 = vector.broadcast %114 : vector<16x1xf32> to vector<16x8xf32>
    %116 = arith.subf %110, %115 : vector<16x8xf32>
    %117 = arith.mulf %116, %116 : vector<16x8xf32>
    %cst_49 = arith.constant dense<0.000000e+00> : vector<16xf32>
    %118 = vector.multi_reduction <add>, %117, %cst_49 [1] : vector<16x8xf32> to vector<16xf32>
    %119 = vector.shape_cast %118 : vector<16xf32> to vector<16x1xf32>
    %cst_50 = arith.constant 8.000000e+00 : f32
    %120 = vector.broadcast %cst_50 : f32 to vector<16x1xf32>
    %121 = arith.divf %119, %120 : vector<16x1xf32>
    %122 = vector.broadcast %114 : vector<16x1xf32> to vector<16x8xf32>
    %123 = arith.subf %110, %122 : vector<16x8xf32>
    %cst_51 = arith.constant 9.99999974E-6 : f32
    %124 = vector.broadcast %cst_51 : f32 to vector<16x1xf32>
    %125 = arith.addf %121, %124 : vector<16x1xf32>
    %126 = math.rsqrt %125 : vector<16x1xf32>
    %127 = vector.broadcast %126 : vector<16x1xf32> to vector<16x8xf32>
    %128 = arith.mulf %123, %127 : vector<16x8xf32>
    %129 = vector.broadcast %20 : vector<1x8xf32> to vector<16x8xf32>
    %130 = arith.mulf %128, %129 : vector<16x8xf32>
    %131 = vector.broadcast %22 : vector<1x8xf32> to vector<16x8xf32>
    %132 = arith.addf %130, %131 : vector<16x8xf32>
    %c0_52 = arith.constant 0 : index
    %c0_53 = arith.constant 0 : index
    %c0_54 = arith.constant 0 : index
    %133 = vector.load %arg12[%c0_52, %c0_53, %c0_54] : memref<1x8x32xf32, #tpu.memory_space<vmem>>, vector<1x8x32xf32>
    %134 = vector.shape_cast %133 : vector<1x8x32xf32> to vector<8x32xf32>
    %cst_55 = arith.constant dense<0.000000e+00> : vector<16x32xf32>
    %135 = tpu.matmul %132, %134, %cst_55 {dimension_numbers = #tpu.dot_dimension_numbers<[1], [0], [0], [1], [0, 0, 1, 1], [], []>} : vector<16x8xf32>, vector<8x32xf32>, vector<16x32xf32> -> vector<16x32xf32>
    %cst_56 = arith.constant 5.000000e-01 : f32
    %136 = vector.broadcast %cst_56 : f32 to vector<16x32xf32>
    %137 = arith.mulf %136, %135 : vector<16x32xf32>
    %cst_57 = arith.constant 0.707106769 : f32
    %138 = vector.broadcast %cst_57 : f32 to vector<16x32xf32>
    %139 = arith.mulf %135, %138 : vector<16x32xf32>
    %140 = math.absf %139 : vector<16x32xf32>
    %cst_58 = arith.constant 0.327591091 : f32
    %141 = vector.broadcast %cst_58 : f32 to vector<16x32xf32>
    %142 = arith.mulf %141, %140 : vector<16x32xf32>
    %cst_59 = arith.constant 1.000000e+00 : f32
    %143 = vector.broadcast %cst_59 : f32 to vector<16x32xf32>
    %144 = arith.addf %143, %142 : vector<16x32xf32>
    %cst_60 = arith.constant 1.000000e+00 : f32
    %145 = vector.broadcast %cst_60 : f32 to vector<16x32xf32>
    %146 = arith.divf %145, %144 : vector<16x32xf32>
    %cst_61 = arith.constant 1.06140542 : f32
    %147 = vector.broadcast %cst_61 : f32 to vector<16x32xf32>
    %148 = arith.mulf %147, %146 : vector<16x32xf32>
    %cst_62 = arith.constant -1.45315206 : f32
    %149 = vector.broadcast %cst_62 : f32 to vector<16x32xf32>
    %150 = arith.addf %148, %149 : vector<16x32xf32>
    %151 = arith.mulf %150, %146 : vector<16x32xf32>
    %cst_63 = arith.constant 1.42141378 : f32
    %152 = vector.broadcast %cst_63 : f32 to vector<16x32xf32>
    %153 = arith.addf %151, %152 : vector<16x32xf32>
    %154 = arith.mulf %153, %146 : vector<16x32xf32>
    %cst_64 = arith.constant -0.284496725 : f32
    %155 = vector.broadcast %cst_64 : f32 to vector<16x32xf32>
    %156 = arith.addf %154, %155 : vector<16x32xf32>
    %157 = arith.mulf %156, %146 : vector<16x32xf32>
    %cst_65 = arith.constant 0.254829586 : f32
    %158 = vector.broadcast %cst_65 : f32 to vector<16x32xf32>
    %159 = arith.addf %157, %158 : vector<16x32xf32>
    %160 = arith.mulf %159, %146 : vector<16x32xf32>
    %cst_66 = arith.constant 0.000000e+00 : f32
    %161 = vector.broadcast %cst_66 : f32 to vector<16x32xf32>
    %162 = arith.subf %161, %140 : vector<16x32xf32>
    %163 = arith.mulf %162, %140 : vector<16x32xf32>
    %164 = math.exp %163 : vector<16x32xf32>
    %165 = arith.mulf %160, %164 : vector<16x32xf32>
    %cst_67 = arith.constant 1.000000e+00 : f32
    %166 = vector.broadcast %cst_67 : f32 to vector<16x32xf32>
    %167 = arith.subf %166, %165 : vector<16x32xf32>
    %cst_68 = arith.constant 0.000000e+00 : f32
    %168 = vector.broadcast %cst_68 : f32 to vector<16x32xf32>
    %169 = arith.cmpf oge, %139, %168 : vector<16x32xf32>
    %cst_69 = arith.constant 0.000000e+00 : f32
    %170 = vector.broadcast %cst_69 : f32 to vector<16x32xf32>
    %171 = arith.subf %170, %167 : vector<16x32xf32>
    %172 = arith.select %169, %167, %171 : vector<16x32xi1>, vector<16x32xf32>
    %cst_70 = arith.constant 1.000000e+00 : f32
    %173 = vector.broadcast %cst_70 : f32 to vector<16x32xf32>
    %174 = arith.addf %173, %172 : vector<16x32xf32>
    %175 = arith.mulf %137, %174 : vector<16x32xf32>
    %c0_71 = arith.constant 0 : index
    %c0_72 = arith.constant 0 : index
    %c0_73 = arith.constant 0 : index
    %176 = vector.load %arg13[%c0_71, %c0_72, %c0_73] : memref<1x32x8xf32, #tpu.memory_space<vmem>>, vector<1x32x8xf32>
    %177 = vector.shape_cast %176 : vector<1x32x8xf32> to vector<32x8xf32>
    %cst_74 = arith.constant dense<0.000000e+00> : vector<16x8xf32>
    %178 = tpu.matmul %175, %177, %cst_74 {dimension_numbers = #tpu.dot_dimension_numbers<[1], [0], [0], [1], [0, 0, 1, 1], [], []>} : vector<16x32xf32>, vector<32x8xf32>, vector<16x8xf32> -> vector<16x8xf32>
    %179 = arith.addf %132, %178 : vector<16x8xf32>
    %cst_75 = arith.constant dense<0.000000e+00> : vector<16xf32>
    %180 = vector.multi_reduction <add>, %179, %cst_75 [1] : vector<16x8xf32> to vector<16xf32>
    %181 = vector.shape_cast %180 : vector<16xf32> to vector<16x1xf32>
    %cst_76 = arith.constant 8.000000e+00 : f32
    %182 = vector.broadcast %cst_76 : f32 to vector<16x1xf32>
    %183 = arith.divf %181, %182 : vector<16x1xf32>
    %184 = vector.broadcast %183 : vector<16x1xf32> to vector<16x8xf32>
    %185 = arith.subf %179, %184 : vector<16x8xf32>
    %186 = arith.mulf %185, %185 : vector<16x8xf32>
    %cst_77 = arith.constant dense<0.000000e+00> : vector<16xf32>
    %187 = vector.multi_reduction <add>, %186, %cst_77 [1] : vector<16x8xf32> to vector<16xf32>
    %188 = vector.shape_cast %187 : vector<16xf32> to vector<16x1xf32>
    %cst_78 = arith.constant 8.000000e+00 : f32
    %189 = vector.broadcast %cst_78 : f32 to vector<16x1xf32>
    %190 = arith.divf %188, %189 : vector<16x1xf32>
    %191 = vector.broadcast %183 : vector<16x1xf32> to vector<16x8xf32>
    %192 = arith.subf %179, %191 : vector<16x8xf32>
    %cst_79 = arith.constant 9.99999974E-6 : f32
    %193 = vector.broadcast %cst_79 : f32 to vector<16x1xf32>
    %194 = arith.addf %190, %193 : vector<16x1xf32>
    %195 = math.rsqrt %194 : vector<16x1xf32>
    %196 = vector.broadcast %195 : vector<16x1xf32> to vector<16x8xf32>
    %197 = arith.mulf %192, %196 : vector<16x8xf32>
    %198 = vector.broadcast %20 : vector<1x8xf32> to vector<16x8xf32>
    %199 = arith.mulf %197, %198 : vector<16x8xf32>
    %200 = vector.broadcast %22 : vector<1x8xf32> to vector<16x8xf32>
    %201 = arith.addf %199, %200 : vector<16x8xf32>
    %cst_80 = arith.constant dense<0.000000e+00> : vector<16x8xf32>
    %202 = tpu.matmul %0, %201, %cst_80 {dimension_numbers = #tpu.dot_dimension_numbers<[1], [0], [0], [1], [0, 0, 1, 1], [], []>} : vector<16x16xf32>, vector<16x8xf32>, vector<16x8xf32> -> vector<16x8xf32>
    %203 = arith.addf %23, %202 : vector<16x8xf32>
    %204 = arith.subf %201, %202 : vector<16x8xf32>
    %205 = arith.addf %203, %204 : vector<16x8xf32>
    %c0_81 = arith.constant 0 : index
    %c0_82 = arith.constant 0 : index
    %206 = vector.load %arg14[%c0_81, %c0_82] : memref<1x8xf32, #tpu.memory_space<vmem>>, vector<1x8xf32>
    %cst_83 = arith.constant dense<0.000000e+00> : vector<1x16xf32>
    %207 = tpu.matmul %206, %205, %cst_83 {dimension_numbers = #tpu.dot_dimension_numbers<[1], [1], [0], [0], [0, 0, 1, 0], [], []>} : vector<1x8xf32>, vector<16x8xf32>, vector<1x16xf32> -> vector<1x16xf32>
    %c0_84 = arith.constant 0 : index
    %c0_85 = arith.constant 0 : index
    %208 = vector.load %arg15[%c0_84, %c0_85] : memref<1x1xf32, #tpu.memory_space<vmem>>, vector<1x1xf32>
    %209 = vector.broadcast %208 : vector<1x1xf32> to vector<1x16xf32>
    %210 = arith.addf %207, %209 : vector<1x16xf32>
    %c0_86 = arith.constant 0 : index
    %c0_87 = arith.constant 0 : index
    %211 = vector.load %arg16[%c0_86, %c0_87] : memref<1x16xf32, #tpu.memory_space<vmem>>, vector<1x16xf32>
    tpu.vector_store %arg16[%c0_86, %c0_87], %210 {strides = array<i32>} : memref<1x16xf32, #tpu.memory_space<vmem>>, vector<1x16xf32>,
    return
  }
  func.func @transform_0(%arg0: i32) -> (i32, i32) {
    %c0_i32 = arith.constant 0 : i32
    %c0_i32_0 = arith.constant 0 : i32
    %c0_i32_1 = arith.constant 0 : i32
    return %c0_i32, %c0_i32_0 : i32, i32
  }
  func.func @transform_1(%arg0: i32) -> (i32, i32) {
    %c0_i32 = arith.constant 0 : i32
    %c0_i32_0 = arith.constant 0 : i32
    %c0_i32_1 = arith.constant 0 : i32
    return %c0_i32, %c0_i32_0 : i32, i32
  }
  func.func @transform_2(%arg0: i32) -> (i32, i32) {
    %c0_i32 = arith.constant 0 : i32
    %c0_i32_0 = arith.constant 0 : i32
    %c0_i32_1 = arith.constant 0 : i32
    return %c0_i32, %c0_i32_0 : i32, i32
  }
  func.func @transform_3(%arg0: i32) -> (i32, i32) {
    %c0_i32 = arith.constant 0 : i32
    %c0_i32_0 = arith.constant 0 : i32
    %c0_i32_1 = arith.constant 0 : i32
    return %c0_i32, %c0_i32_0 : i32, i32
  }
  func.func @transform_4(%arg0: i32) -> (i32, i32, i32) {
    %c0_i32 = arith.constant 0 : i32
    %c0_i32_0 = arith.constant 0 : i32
    %c0_i32_1 = arith.constant 0 : i32
    %c0_i32_2 = arith.constant 0 : i32
    return %c0_i32, %c0_i32_0, %c0_i32_1 : i32, i32, i32
  }
  func.func @transform_5(%arg0: i32) -> (i32, i32, i32) {
    %c0_i32 = arith.constant 0 : i32
    %c0_i32_0 = arith.constant 0 : i32
    %c0_i32_1 = arith.constant 0 : i32
    %c0_i32_2 = arith.constant 0 : i32
    return %c0_i32, %c0_i32_0, %c0_i32_1 : i32, i32, i32
  }
  func.func @transform_6(%arg0: i32) -> (i32, i32, i32) {
    %c0_i32 = arith.constant 0 : i32
    %c0_i32_0 = arith.constant 0 : i32
    %c0_i32_1 = arith.constant 0 : i32
    %c0_i32_2 = arith.constant 0 : i32
    return %c0_i32, %c0_i32_0, %c0_i32_1 : i32, i32, i32
  }
  func.func @transform_7(%arg0: i32) -> (i32, i32, i32) {
    %c0_i32 = arith.constant 0 : i32
    %c0_i32_0 = arith.constant 0 : i32
    %c0_i32_1 = arith.constant 0 : i32
    %c0_i32_2 = arith.constant 0 : i32
    return %c0_i32, %c0_i32_0, %c0_i32_1 : i32, i32, i32
  }
  func.func @transform_8(%arg0: i32) -> (i32, i32, i32) {
    %c0_i32 = arith.constant 0 : i32
    %c0_i32_0 = arith.constant 0 : i32
    %c0_i32_1 = arith.constant 0 : i32
    %c0_i32_2 = arith.constant 0 : i32
    return %c0_i32, %c0_i32_0, %c0_i32_1 : i32, i32, i32
  }
  func.func @transform_9(%arg0: i32) -> (i32, i32, i32) {
    %c0_i32 = arith.constant 0 : i32
    %c0_i32_0 = arith.constant 0 : i32
    %c0_i32_1 = arith.constant 0 : i32
    %c0_i32_2 = arith.constant 0 : i32
    return %c0_i32, %c0_i32_0, %c0_i32_1 : i32, i32, i32
  }
  func.func @transform_10(%arg0: i32) -> (i32, i32, i32) {
    %c0_i32 = arith.constant 0 : i32
    %c0_i32_0 = arith.constant 0 : i32
    %c0_i32_1 = arith.constant 0 : i32
    %c0_i32_2 = arith.constant 0 : i32
    return %c0_i32, %c0_i32_0, %c0_i32_1 : i32, i32, i32
  }
  func.func @transform_11(%arg0: i32) -> (i32, i32, i32) {
    %c0_i32 = arith.constant 0 : i32
    %c0_i32_0 = arith.constant 0 : i32
    %c0_i32_1 = arith.constant 0 : i32
    %c0_i32_2 = arith.constant 0 : i32
    return %c0_i32, %c0_i32_0, %c0_i32_1 : i32, i32, i32
  }
  func.func @transform_12(%arg0: i32) -> (i32, i32, i32) {
    %c0_i32 = arith.constant 0 : i32
    %c0_i32_0 = arith.constant 0 : i32
    %c0_i32_1 = arith.constant 0 : i32
    %c0_i32_2 = arith.constant 0 : i32
    return %c0_i32, %c0_i32_0, %c0_i32_1 : i32, i32, i32
  }
  func.func @transform_13(%arg0: i32) -> (i32, i32) {
    %c0_i32 = arith.constant 0 : i32
    %c0_i32_0 = arith.constant 0 : i32
    %c0_i32_1 = arith.constant 0 : i32
    return %c0_i32, %c0_i32_0 : i32, i32
  }
  func.func @transform_14(%arg0: i32) -> (i32, i32) {
    %c0_i32 = arith.constant 0 : i32
    %c0_i32_0 = arith.constant 0 : i32
    %c0_i32_1 = arith.constant 0 : i32
    return %c0_i32, %c0_i32_0 : i32, i32
  }
  func.func @transform_15(%arg0: i32) -> (i32, i32) {
    %c0_i32 = arith.constant 0 : i32
    %c0_i32_0 = arith.constant 0 : i32
    %c0_i32_1 = arith.constant 0 : i32
    return %c0_i32, %c0_i32_0 : i32, i32
  }
}

</mosaic_0001>

<bundles_post_ra>
// kernel: autoformer_forward.1
= control target key start
LH: loop header
LB: loop body
LE: loop exit
PB: predicated region body
PF: predicated region fallthrough
CT: control target
= control target key end

     0   :  { %v1867_v0 = vmov 0   ;;  %vm91_vm0 = vcmask 130048   ;;  %v1868_v4 = vmov 0.0   ;;  %vm1869_vm1 = vmmov 0   ;;  %s2443_s0 = inlined_call_operand.vmem [shape: f32[16,1], index: 0, kind: input, shape index: {}]   ;;  %s2444_s1 = inlined_call_operand.vmem [shape: f32[16,16], index: 1, kind: input, shape index: {}]   ;;  %s2445_s4 = inlined_call_operand.vmem [shape: f32[1,8,16], index: 4, kind: input, shape index: {}]   ;;  %s2446_s2 = inlined_call_operand.vmem [shape: f32[1,8], index: 2, kind: input, shape index: {}]   ;;  %s2447_s3 = inlined_call_operand.vmem [shape: f32[1,8], index: 3, kind: input, shape index: {}]   ;;  %s2448_s5 = inlined_call_operand.vmem [shape: f32[1,8,8], index: 5, kind: input, shape index: {}]   ;;  %s2449_s6 = inlined_call_operand.vmem [shape: f32[1,8,8], index: 6, kind: input, shape index: {}]   ;;  %s2450_s7 = inlined_call_operand.vmem [shape: f32[1,1,8], index: 7, kind: input, shape index: {}]   ;;  %s2451_s8 = inlined_call_operand.vmem [shape: f32[1,1,8], index: 8, kind: input, shape index: {}]   ;;  %s2452_s11 = inlined_call_operand.vmem [shape: f32[1,8,32], index: 11, kind: input, shape index: {}]   ;;  %s2453_s9 = inlined_call_operand.vmem [shape: f32[1,1,8], index: 9, kind: input, shape index: {}]   ;;  %s2454_s10 = inlined_call_operand.vmem [shape: f32[1,1,8], index: 10, kind: input, shape index: {}]   ;;  %s2455_s12 = inlined_call_operand.vmem [shape: f32[1,32,8], index: 12, kind: input, shape index: {}]   ;;  %s2456_s14 = inlined_call_operand.<no memory space> [shape: f32[1,1], index: 14, kind: input, shape index: {}]   ;;  %s2457_s13 = inlined_call_operand.vmem [shape: f32[1,8], index: 13, kind: input, shape index: {}]   ;;  %s2458_s15 = inlined_call_operand.vmem [shape: f32[1,16], index: 15, kind: output, shape index: {}]  }
   0x1   :  { %1778 = vset.pattern.permute.xlu0 %v1867_v0  ;;  %v54_v1 = vld [vmem:[%s2443_s0] sm:$0xff]  ;;  %1779 = vset.pattern.permute.xlu1 %v1867_v0  ;;  %v55_v2 = vld [vmem:[%s2443_s0 + $0x8] sm:$0xff]  ;;  %vm175_vm2 = vcmask 64512   ;;  %v322_v21 = vlaneseq  ;;  %vm1354_vm5 = vcmask 261120   ;;  %vm1639_vm7 = vcmask 122880  }
   0x2   :  { %59 = vperm.xlu0 %1778, %v54_v1   ;;  %v52_v3 = vld [vmem:[%s2444_s1] sm:$0xff]  ;;  %1703 = vmatprep.subr.mxu1 %v1868_v4  ;;  %v53_v15 = vld [vmem:[%s2444_s1 + $0x8] sm:$0xff]  ;;  %vm1771_vm6 = vmpackc.low %vm175_vm2, %vm175_vm2 }
   0x3   :  { %1700 = vmatprep.mubr.msk.f32.mxu0 %vm91_vm0, %v52_v3  ;;  %v84_v5 = vld [vmem:[%s2445_s4] sm:$0xff]  ;;  %1705 = vmatprep.mubr.msk.f32.mxu1 %vm1869_vm1, %v1868_v4  ;;  %v2010_v22 = vshrl.u32 %v322_v21, 7 }
   0x4   :  { %1704 = vmatpush3.msra.mxu1 %v84_v5  ;;  %v1645_v6 = vld [vmem:[%s2446_s2] ss:$0 sm:$0xff] }
   0x5   :  { %1708 = vmatprep.subr.mxu1 %v1868_v4  ;;  %v1646_v9 = vld [vmem:[%s2447_s3] ss:$0 sm:$0xff]  ;;  %v2013_v23 = vsub.s32 2, %v2010_v22  ;;  %v2016_v24 = vsub.s32 0, %v2010_v22  ;;  %v2021_v29 = vsub.s32 3, %v2010_v22  ;;  %v2024_v30 = vsub.s32 1, %v2010_v22 }
   0x6   :  { %64 = vperm.xlu0 %1778, %v55_v2   ;;  %v85_v19 = vld [vmem:[%s2448_s5] sm:$0xff]  ;;  %v2031_v35 = vsub.s32 4, %v2010_v22  ;;  %v2035_v39 = vsub.s32 5, %v2010_v22  ;;  %v2042_v42 = vsub.s32 6, %v2010_v22  ;;  %v2055_v49 = vsub.s32 7, %v2010_v22 }
  0x81   :  { %v60_v7 = vpop.permute.xlu0 %59 }
  0x82   :  { %v73_v8 = vmul.f32 %v1645_v6, %v60_v7 }
  0x84   :  { %v82_v12 = vadd.f32 %v1646_v9, %v73_v8 }
  0x85   :  { %v65_v10 = vpop.permute.xlu0 %64 }
  0x86   :  { %v74_v11 = vmul.f32 %v1645_v6, %v65_v10 }
  0x88   :  { %v83_v13 = vadd.f32 %v1646_v9, %v74_v11 }
  0x8a   :  { %v1753_v14 = vpack.c.bf16 %v83_v13, %v82_v12 }
  0x8c   :  { %1754 = vmatprep.subr.bf16.mxu0 %v1753_v14 }
  0x8d   :  { %1756 = vmatpush3.bf16.msra.mxu0 %v1753_v14 }
  0x90   :  { %1701 = vmatmul.mubr.msk.f32.vlgmr.msra.gmra.mrb[0].mxu0 %vm91_vm0, %v53_v15 }
 0x163   :  { %v1979_v16 = vpop.f32.mrb[0].mxu0 }
 0x164   :  { %v1981_v17 = vpop.f32.mrb[1].mxu0  ;;  %v2000_v20 = vsub.f32 %v83_v13, %v1979_v16 }
 0x165   :  { %v1984_v18 = vsub.f32 %v82_v12, %v1981_v17 }
 0x167   :  { %1706 = vmatmul.mubr.msk.f32.vlgmr.msra.gmra.mrb[0].mxu1 %vm175_vm2, %v1984_v18 }
 0x168   :  { %1709 = vmatpush3.xpose.msk.msra.mxu1 %vm175_vm2, %v1984_v18  ;;  %1710 = vmatprep.mubr.msk.f32.mxu1 %vm1869_vm1, %v1868_v4 }
 0x169   :  { %1713 = vmatprep.subr.mxu1 %v1868_v4 }
 0x16b   :  { %1711 = vmatmul.mubr.msk.f32.vlgmr.msra.gmra.mrb[2].mxu1 %vm175_vm2, %v85_v19 }
 0x16c   :  { %1714 = vmatpush3.msra.mxu1 %v84_v5  ;;  %1715 = vmatprep.mubr.msk.f32.mxu1 %vm1869_vm1, %v1868_v4 }
 0x16d   :  { %1718 = vmatprep.subr.mxu1 %v1868_v4 }
 0x16f   :  { %1716 = vmatmul.mubr.msk.f32.vlgmr.msra.gmra.mrb[4].mxu1 %vm175_vm2, %v2000_v20 }
 0x170   :  { %1720 = vmatprep.mubr.msk.f32.mxu1 %vm1869_vm1, %v1868_v4 }
 0x173   :  { %1719 = vmatpush3.xpose.msk.msra.mxu1 %vm175_vm2, %v2000_v20 }
 0x176   :  { %1721 = vmatmul.mubr.msk.f32.vlgmr.msra.gmra.mrb[6].mxu1 %vm175_vm2, %v85_v19 }
 0x23a   :  { %v245_v25 = vpop.f32.mrb[0].mxu1 }
 0x23b   :  { %v1707_v26 = vpop.f32.mrb[1].mxu1  ;;  %v339_v27 = vrot.slane %v245_v25, %v2013_v23  ;;  %v325_v28 = vrot.slane %v245_v25, %v2016_v24  ;;  %v346_v32 = vrot.slane %v245_v25, %v2021_v29  ;;  %v332_v33 = vrot.slane %v245_v25, %v2024_v30 }
 0x23c   :  { %v353_v38 = vrot.slane %v245_v25, %v2031_v35  ;;  %v2038_v40 = vrot.slane %v245_v25, %v2035_v39  ;;  %v2048_v45 = vrot.slane %v245_v25, %v2042_v42  ;;  %v2059_v51 = vrot.slane %v245_v25, %v2055_v49 }
 0x23d   :  { %341 = vbcast.lane.b32.xlu0 %v339_v27, 256  ;;  %327 = vbcast.lane.b32.xlu1 %v325_v28, 256 }
 0x23e   :  { %v2026_v31 = vpop.f32.mrb[2].mxu1 }
 0x23f   :  { %v1712_v34 = vpop.f32.mrb[3].mxu1 }
 0x241   :  { %348 = vbcast.lane.b32.xlu0 %v346_v32, 256  ;;  %334 = vbcast.lane.b32.xlu1 %v332_v33, 256 }
 0x242   :  { %v767_v36 = vpop.f32.mrb[4].mxu1 }
 0x243   :  { %v1717_v37 = vpop.f32.mrb[5].mxu1  ;;  %v851_v41 = vrot.slane %v767_v36, %v2024_v30  ;;  %v858_v46 = vrot.slane %v767_v36, %v2013_v23  ;;  %v865_v47 = vrot.slane %v767_v36, %v2021_v29  ;;  %v844_v48 = vrot.slane %v767_v36, %v2016_v24 }
 0x244   :  { %v872_v50 = vrot.slane %v767_v36, %v2031_v35  ;;  %v2063_v52 = vrot.slane %v767_v36, %v2035_v39  ;;  %v2067_v53 = vrot.slane %v767_v36, %v2042_v42  ;;  %v2071_v54 = vrot.slane %v767_v36, %v2055_v49 }
 0x245   :  { %355 = vbcast.lane.b32.xlu0 %v353_v38, 256  ;;  %476 = vbcast.lane.b32.xlu1 %v325_v28, 264 }
 0x249   :  { %362 = vbcast.lane.b32.xlu0 %v2038_v40, 256  ;;  %853 = vbcast.lane.b32.xlu1 %v851_v41, 256  ;;  %v2045_v43 = vpop.f32.mrb[6].mxu1 }
 0x24a   :  { %v1722_v44 = vpop.f32.mrb[7].mxu1 }
 0x24d   :  { %369 = vbcast.lane.b32.xlu0 %v2048_v45, 256  ;;  %860 = vbcast.lane.b32.xlu1 %v858_v46, 256 }
 0x251   :  { %867 = vbcast.lane.b32.xlu1 %v865_v47, 256  ;;  %846 = vbcast.lane.b32.xlu0 %v844_v48, 256 }
 0x255   :  { %874 = vbcast.lane.b32.xlu1 %v872_v50, 256  ;;  %376 = vbcast.lane.b32.xlu0 %v2059_v51, 256 }
 0x259   :  { %881 = vbcast.lane.b32.xlu1 %v2063_v52, 256  ;;  %480 = vbcast.lane.b32.xlu0 %v332_v33, 264 }
 0x25d   :  { %888 = vbcast.lane.b32.xlu1 %v2067_v53, 256  ;;  %484 = vbcast.lane.b32.xlu0 %v339_v27, 264 }
 0x261   :  { %895 = vbcast.lane.b32.xlu1 %v2071_v54, 256  ;;  %488 = vbcast.lane.b32.xlu0 %v346_v32, 264 }
 0x265   :  { %995 = vbcast.lane.b32.xlu1 %v844_v48, 264  ;;  %492 = vbcast.lane.b32.xlu0 %v353_v38, 264 }
 0x269   :  { %999 = vbcast.lane.b32.xlu1 %v851_v41, 264 }
 0x26d   :  { %1003 = vbcast.lane.b32.xlu1 %v858_v46, 264 }
 0x271   :  { %1007 = vbcast.lane.b32.xlu1 %v865_v47, 264 }
 0x275   :  { %1011 = vbcast.lane.b32.xlu1 %v872_v50, 264 }
 0x2af   :  { %v342_v55 = vpop.permute.xlu0 %341  ;;  %v328_v56 = vpop.permute.xlu1 %327 }
 0x2b0   :  { %v2075_v57 = vmul.f32 %v328_v56, %v2026_v31  ;;  %v2083_v62 = vmul.f32 %v342_v55, %v2026_v31 }
 0x2b2   :  { %v386_v58 = vsel %vm175_vm2, %v2075_v57, -inf  ;;  %v392_v3 = vsel %vm175_vm2, %v2083_v62, -inf }
 0x2b3   :  { %v349_v59 = vpop.permute.xlu0 %348  ;;  %v335_v60 = vpop.permute.xlu1 %334  ;;  %387 = vmax.xlane.f32.xlu0 %v386_v58 }
 0x2b4   :  { %v2080_v61 = vmul.f32 %v335_v60, %v2026_v31  ;;  %v2090_v2 = vmul.f32 %v349_v59, %v2026_v31 }
 0x2b6   :  { %v389_v63 = vsel %vm175_vm2, %v2080_v61, -inf  ;;  %v395_v8 = vsel %vm175_vm2, %v2090_v2, -inf }
 0x2b7   :  { %v356_v0 = vpop.permute.xlu0 %355  ;;  %v2087_v1 = vpop.permute.xlu1 %476  ;;  %390 = vmax.xlane.f32.xlu1 %v389_v63 }
 0x2b8   :  { %v2095_v7 = vmul.f32 %v356_v0, %v2026_v31 }
 0x2ba   :  { %v398_v12 = vsel %vm175_vm2, %v2095_v7, -inf }
 0x2bb   :  { %v363_v5 = vpop.permute.xlu0 %362  ;;  %v854_v6 = vpop.permute.xlu1 %853  ;;  %393 = vmax.xlane.f32.xlu1 %v392_v3 }
 0x2bc   :  { %v2100_v11 = vmul.f32 %v363_v5, %v2026_v31  ;;  %v2115_v26 = vmul.f32 %v854_v6, %v2045_v43 }
 0x2be   :  { %v401_v21 = vsel %vm175_vm2, %v2100_v11, -inf  ;;  %v908_v36 = vsel %vm175_vm2, %v2115_v26, -inf }
 0x2bf   :  { %v370_v9 = vpop.permute.xlu0 %369  ;;  %v861_v10 = vpop.permute.xlu1 %860  ;;  %396 = vmax.xlane.f32.xlu1 %v395_v8 }
 0x2c0   :  { %v2108_v19 = vmul.f32 %v370_v9, %v2026_v31  ;;  %v2118_v32 = vmul.f32 %v861_v10, %v2045_v43 }
 0x2c2   :  { %v404_v34 = vsel %vm175_vm2, %v2108_v19, -inf  ;;  %v911_v41 = vsel %vm175_vm2, %v2118_v32, -inf }
 0x2c3   :  { %v868_v13 = vpop.permute.xlu1 %867  ;;  %399 = vmax.xlane.f32.xlu1 %v398_v12  ;;  %v847_v14 = vpop.permute.xlu0 %846 }
 0x2c4   :  { %v2105_v15 = vmul.f32 %v847_v14, %v2045_v43  ;;  %v2128_v37 = vmul.f32 %v868_v13, %v2045_v43 }
 0x2c6   :  { %v905_v25 = vsel %vm175_vm2, %v2105_v15, -inf  ;;  %v914_v46 = vsel %vm175_vm2, %v2128_v37, -inf }
 0x2c7   :  { %402 = vmax.xlane.f32.xlu1 %v401_v21  ;;  %v377_v27 = vpop.permute.xlu0 %376  ;;  %906 = vmax.xlane.f32.xlu0 %v905_v25  ;;  %v875_v28 = vpop.permute.xlu1 %874 }
 0x2c8   :  { %v2121_v33 = vmul.f32 %v377_v27, %v2026_v31  ;;  %v2135_v31 = vmul.f32 %v875_v28, %v2045_v43 }
 0x2ca   :  { %v407_v38 = vsel %vm175_vm2, %v2121_v33, -inf  ;;  %v917_v50 = vsel %vm175_vm2, %v2135_v31, -inf }
 0x2cb   :  { %405 = vmax.xlane.f32.xlu1 %v404_v34  ;;  %909 = vmax.xlane.f32.xlu0 %v908_v36  ;;  %v882_v44 = vpop.permute.xlu1 %881  ;;  %v2161_v3 = vpop.permute.xlu0 %480 }
 0x2cc   :  { %v2140_v48 = vmul.f32 %v882_v44, %v2045_v43 }
 0x2ce   :  { %v920_v56 = vsel %vm175_vm2, %v2140_v48, -inf }
 0x2cf   :  { %408 = vmax.xlane.f32.xlu1 %v407_v38  ;;  %912 = vmax.xlane.f32.xlu0 %v911_v41  ;;  %v889_v47 = vpop.permute.xlu1 %888  ;;  %v2165_v5 = vpop.permute.xlu0 %484 }
 0x2d0   :  { %v2145_v55 = vmul.f32 %v889_v47, %v2045_v43 }
 0x2d2   :  { %v923_v60 = vsel %vm175_vm2, %v2145_v55, -inf }
 0x2d3   :  { %915 = vmax.xlane.f32.xlu0 %v914_v46  ;;  %v896_v58 = vpop.permute.xlu1 %895  ;;  %v2169_v8 = vpop.permute.xlu0 %488 }
 0x2d4   :  { %v2150_v59 = vmul.f32 %v896_v58, %v2045_v43 }
 0x2d6   :  { %v926_v63 = vsel %vm175_vm2, %v2150_v59, -inf }
 0x2d7   :  { %918 = vmax.xlane.f32.xlu0 %v917_v50  ;;  %v2159_v0 = vpop.permute.xlu1 %995  ;;  %v2173_v9 = vpop.permute.xlu0 %492 }
 0x2db   :  { %921 = vmax.xlane.f32.xlu0 %v920_v56  ;;  %v2163_v43 = vpop.permute.xlu1 %999 }
 0x2df   :  { %924 = vmax.xlane.f32.xlu0 %v923_v60  ;;  %v2167_v6 = vpop.permute.xlu1 %1003 }
 0x2e0   :  { %1015 = vbcast.lane.b32.xlu1 %v2063_v52, 264 }
 0x2e3   :  { %927 = vmax.xlane.f32.xlu0 %v926_v63  ;;  %v2171_v52 = vpop.permute.xlu1 %1007 }
 0x2e7   :  { %v2175_v10 = vpop.permute.xlu1 %1011 }
 0x2f9   :  { %496 = vbcast.lane.b32.xlu0 %v2038_v40, 264 }
 0x2fd   :  { %500 = vbcast.lane.b32.xlu0 %v2048_v45, 264 }
 0x340   :  { %v388_v40 = vpop.xlane.xlu0 %387 }
 0x341   :  { %v410_v45 = vsub.f32 %v2075_v57, %v388_v40 }
 0x343   :  { %v418_v12 = vmul.f32 1.442695, %v410_v45 }
 0x344   :  { %v391_v13 = vpop.xlane.xlu1 %390 }
 0x345   :  { %1781 = vpow2.f32 %v418_v12  ;;  %v411_v14 = vsub.f32 %v2080_v61, %v391_v13 }
 0x347   :  { %v420_v21 = vmul.f32 1.442695, %v411_v14 }
 0x348   :  { %v394_v25 = vpop.xlane.xlu1 %393 }
 0x349   :  { %1783 = vpow2.f32 %v420_v21  ;;  %v412_v27 = vsub.f32 %v2083_v62, %v394_v25 }
 0x34b   :  { %v422_v28 = vmul.f32 1.442695, %v412_v27 }
 0x34c   :  { %v397_v34 = vpop.xlane.xlu1 %396 }
 0x34d   :  { %1785 = vpow2.f32 %v422_v28  ;;  %v413_v36 = vsub.f32 %v2090_v2, %v397_v34 }
 0x34f   :  { %v2181_v38 = vpop.eup %1781  ;;  %v424_v41 = vmul.f32 1.442695, %v413_v36 }
 0x350   :  { %v400_v44 = vpop.xlane.xlu1 %399  ;;  %v434_v57 = vsel %vm175_vm2, %v2181_v38, 0.0 }
 0x351   :  { %1787 = vpow2.f32 %v424_v41  ;;  %v414_v61 = vsub.f32 %v2095_v7, %v400_v44  ;;  %435 = vadd.xlane.f32.xlu1 %v434_v57 }
 0x353   :  { %v2186_v46 = vpop.eup %1783  ;;  %v426_v47 = vmul.f32 1.442695, %v414_v61 }
 0x354   :  { %v403_v62 = vpop.xlane.xlu1 %402  ;;  %v907_v50 = vpop.xlane.xlu0 %906  ;;  %v437_v56 = vsel %vm175_vm2, %v2186_v46, 0.0 }
 0x355   :  { %1789 = vpow2.f32 %v426_v47  ;;  %v415_v2 = vsub.f32 %v2100_v11, %v403_v62  ;;  %438 = vadd.xlane.f32.xlu0 %v437_v56  ;;  %v929_v14 = vsub.f32 %v2105_v15, %v907_v50 }
 0x357   :  { %v2191_v58 = vpop.eup %1785  ;;  %v428_v60 = vmul.f32 1.442695, %v415_v2 }
 0x358   :  { %v406_v63 = vpop.xlane.xlu1 %405  ;;  %v910_v40 = vpop.xlane.xlu0 %909  ;;  %v440_v7 = vsel %vm175_vm2, %v2191_v58, 0.0 }
 0x359   :  { %1791 = vpow2.f32 %v428_v60  ;;  %v416_v45 = vsub.f32 %v2108_v19, %v406_v63  ;;  %v930_v12 = vsub.f32 %v2115_v26, %v910_v40  ;;  %441 = vadd.xlane.f32.xlu1 %v440_v7  ;;  %v937_v26 = vmul.f32 1.442695, %v929_v14 }
 0x35b   :  { %v2197_v13 = vpop.eup %1787  ;;  %v430_v11 = vmul.f32 1.442695, %v416_v45  ;;  %v939_v21 = vmul.f32 1.442695, %v930_v12 }
 0x35c   :  { %v409_v25 = vpop.xlane.xlu1 %408  ;;  %v913_v27 = vpop.xlane.xlu0 %912  ;;  %v443_v28 = vsel %vm175_vm2, %v2197_v13, 0.0 }
 0x35d   :  { %1793 = vpow2.f32 %v430_v11  ;;  %v417_v34 = vsub.f32 %v2121_v33, %v409_v25  ;;  %v931_v36 = vsub.f32 %v2118_v32, %v913_v27  ;;  %444 = vadd.xlane.f32.xlu1 %v443_v28 }
 0x35e   :  { %1795 = vpow2.f32 %v939_v21 }
 0x35f   :  { %v2204_v19 = vpop.eup %1789  ;;  %v432_v41 = vmul.f32 1.442695, %v417_v34  ;;  %v941_v44 = vmul.f32 1.442695, %v931_v36 }
 0x360   :  { %v916_v15 = vpop.xlane.xlu0 %915  ;;  %v446_v57 = vsel %vm175_vm2, %v2204_v19, 0.0 }
 0x361   :  { %1797 = vpow2.f32 %v432_v41  ;;  %v932_v61 = vsub.f32 %v2128_v37, %v916_v15  ;;  %447 = vadd.xlane.f32.xlu1 %v446_v57 }
 0x362   :  { %1799 = vpow2.f32 %v941_v44 }
 0x363   :  { %v2209_v47 = vpop.eup %1791  ;;  %1801 = vpow2.f32 %v937_v26  ;;  %v943_v32 = vmul.f32 1.442695, %v932_v61 }
 0x364   :  { %v919_v33 = vpop.xlane.xlu0 %918  ;;  %v449_v62 = vsel %vm175_vm2, %v2209_v47, 0.0 }
 0x365   :  { %1803 = vpow2.f32 %v943_v32  ;;  %v933_v50 = vsub.f32 %v2135_v31, %v919_v33  ;;  %450 = vadd.xlane.f32.xlu1 %v449_v62 }
 0x367   :  { %v2214_v56 = vpop.eup %1793  ;;  %v945_v2 = vmul.f32 1.442695, %v933_v50  ;;  %v2260_v50 = vpop.permute.xlu1 %1015 }
 0x368   :  { %v2216_v60 = vpop.eup %1795  ;;  %v922_v37 = vpop.xlane.xlu0 %921  ;;  %v452_v63 = vsel %vm175_vm2, %v2214_v56, 0.0 }
 0x369   :  { %1805 = vpow2.f32 %v945_v2  ;;  %v934_v40 = vsub.f32 %v2140_v48, %v922_v37  ;;  %453 = vadd.xlane.f32.xlu1 %v452_v63  ;;  %v956_v7 = vsel %vm175_vm2, %v2216_v60, 0.0 }
 0x36a   :  { %957 = vadd.xlane.f32.xlu0 %v956_v7 }
 0x36b   :  { %v2223_v45 = vpop.eup %1797  ;;  %v947_v31 = vmul.f32 1.442695, %v934_v40 }
 0x36c   :  { %v2225_v12 = vpop.eup %1799  ;;  %v925_v14 = vpop.xlane.xlu0 %924  ;;  %v455_v11 = vsel %vm175_vm2, %v2223_v45, 0.0 }
 0x36d   :  { %v2229_v21 = vpop.eup %1801  ;;  %1807 = vpow2.f32 %v947_v31  ;;  %v935_v25 = vsub.f32 %v2145_v55, %v925_v14  ;;  %456 = vadd.xlane.f32.xlu1 %v455_v11  ;;  %v959_v48 = vsel %vm175_vm2, %v2225_v12, 0.0 }
 0x36e   :  { %960 = vadd.xlane.f32.xlu0 %v959_v48  ;;  %v953_v36 = vsel %vm175_vm2, %v2229_v21, 0.0 }
 0x36f   :  { %v2234_v27 = vpop.eup %1803  ;;  %v949_v28 = vmul.f32 1.442695, %v935_v25 }
 0x370   :  { %v928_v34 = vpop.xlane.xlu0 %927  ;;  %v962_v26 = vsel %vm175_vm2, %v2234_v27, 0.0 }
 0x371   :  { %1809 = vpow2.f32 %v949_v28  ;;  %v936_v41 = vsub.f32 %v2150_v59, %v928_v34  ;;  %954 = vadd.xlane.f32.xlu1 %v953_v36 }
 0x372   :  { %963 = vadd.xlane.f32.xlu0 %v962_v26 }
 0x373   :  { %v2241_v55 = vpop.eup %1805  ;;  %v951_v44 = vmul.f32 1.442695, %v936_v41 }
 0x374   :  { %v965_v15 = vsel %vm175_vm2, %v2241_v55, 0.0  ;;  %v2262_v37 = vpop.permute.xlu0 %496 }
 0x375   :  { %1811 = vpow2.f32 %v951_v44 }
 0x376   :  { %966 = vadd.xlane.f32.xlu0 %v965_v15 }
 0x377   :  { %v2245_v57 = vpop.eup %1807 }
 0x378   :  { %v968_v61 = vsel %vm175_vm2, %v2245_v57, 0.0  ;;  %v2264_v7 = vpop.permute.xlu0 %500 }
 0x37a   :  { %969 = vadd.xlane.f32.xlu0 %v968_v61 }
 0x37b   :  { %v2249_v32 = vpop.eup %1809 }
 0x37c   :  { %v971_v59 = vsel %vm175_vm2, %v2249_v32, 0.0 }
 0x37e   :  { %972 = vadd.xlane.f32.xlu0 %v971_v59 }
 0x37f   :  { %v2253_v33 = vpop.eup %1811 }
 0x380   :  { %v974_v62 = vsel %vm175_vm2, %v2253_v33, 0.0 }
 0x382   :  { %975 = vadd.xlane.f32.xlu0 %v974_v62  ;;  %1019 = vbcast.lane.b32.xlu1 %v2067_v53, 264 }
 0x386   :  { %1023 = vbcast.lane.b32.xlu1 %v2071_v54, 264 }
 0x398   :  { %504 = vbcast.lane.b32.xlu0 %v2059_v51, 264 }
 0x3de   :  { %v436_v2 = vpop.xlane.xlu1 %435 }
 0x3df   :  { %1813 = vrcp.f32 %v436_v2 }
 0x3e2   :  { %v439_v14 = vpop.xlane.xlu0 %438 }
 0x3e3   :  { %1815 = vrcp.f32 %v439_v14 }
 0x3e6   :  { %v442_v63 = vpop.xlane.xlu1 %441 }
 0x3e7   :  { %1817 = vrcp.f32 %v442_v63 }
 0x3e9   :  { %v1814_v48 = vpop.eup %1813 }
 0x3ea   :  { %v445_v40 = vpop.xlane.xlu1 %444  ;;  %v459_v15 = vmul.f32 %v1814_v48, %v2181_v38 }
 0x3eb   :  { %1819 = vrcp.f32 %v445_v40 }
 0x3ec   :  { %v506_v14 = vmul.f32 %v2087_v1, %v459_v15 }
 0x3ed   :  { %v1816_v28 = vpop.eup %1815 }
 0x3ee   :  { %v448_v31 = vpop.xlane.xlu1 %447  ;;  %v461_v44 = vmul.f32 %v1816_v28, %v2186_v46 }
 0x3ef   :  { %1821 = vrcp.f32 %v448_v31 }
 0x3f0   :  { %v507_v40 = vmul.f32 %v2161_v3, %v461_v44 }
 0x3f1   :  { %v1818_v34 = vpop.eup %1817 }
 0x3f2   :  { %v451_v11 = vpop.xlane.xlu1 %450  ;;  %v463_v61 = vmul.f32 %v1818_v34, %v2191_v58 }
 0x3f5   :  { %v1820_v41 = vpop.eup %1819 }
 0x3f6   :  { %v454_v53 = vpop.xlane.xlu1 %453  ;;  %v465_v2 = vmul.f32 %v1820_v41, %v2197_v13  ;;  %v515_v13 = vsel %vm175_vm2, %v507_v40, 0.0 }
 0x3f7   :  { %v958_v54 = vpop.xlane.xlu0 %957 }
 0x3f8   :  { %1823 = vrcp.f32 %v958_v54  ;;  %v509_v54 = vmul.f32 %v2169_v8, %v465_v2 }
 0x3f9   :  { %1825 = vrcp.f32 %v451_v11  ;;  %v1822_v59 = vpop.eup %1821  ;;  %v508_v11 = vmul.f32 %v2165_v5, %v463_v61  ;;  %v514_v5 = vsel %vm175_vm2, %v506_v14, 0.0 }
 0x3fa   :  { %v457_v51 = vpop.xlane.xlu1 %456 }
 0x3fb   :  { %v961_v25 = vpop.xlane.xlu0 %960 }
 0x3fc   :  { %1827 = vrcp.f32 %v961_v25 }
 0x3fd   :  { %1829 = vrcp.f32 %v454_v53  ;;  %v467_v53 = vmul.f32 %v1822_v59, %v2204_v19 }
 0x3fe   :  { %v955_v36 = vpop.xlane.xlu1 %954 }
 0x3ff   :  { %1831 = vrcp.f32 %v955_v36  ;;  %v964_v26 = vpop.xlane.xlu0 %963  ;;  %v510_v34 = vmul.f32 %v2173_v9, %v467_v53 }
 0x400   :  { %1833 = vrcp.f32 %v964_v26  ;;  %v516_v26 = vadd.f32 %v515_v13, %v514_v5 }
 0x402   :  { %v1824_v62 = vpop.eup %1823 }
 0x403   :  { %v967_v63 = vpop.xlane.xlu0 %966  ;;  %v1826_v31 = vpop.eup %1825  ;;  %v980_v38 = vmul.f32 %v1824_v62, %v2216_v60 }
 0x404   :  { %1835 = vrcp.f32 %v967_v63  ;;  %v469_v3 = vmul.f32 %v1826_v31, %v2209_v47 }
 0x405   :  { %1837 = vrcp.f32 %v457_v51  ;;  %v517_v51 = vsel %vm175_vm2, %v508_v11, 0.0  ;;  %v1026_v19 = vmul.f32 %v2163_v43, %v980_v38 }
 0x406   :  { %v1828_v46 = vpop.eup %1827  ;;  %v511_v15 = vmul.f32 %v2262_v37, %v469_v3  ;;  %v518_v43 = vadd.f32 %v517_v51, %v516_v26 }
 0x407   :  { %v1830_v58 = vpop.eup %1829  ;;  %v970_v25 = vpop.xlane.xlu0 %969  ;;  %v982_v48 = vmul.f32 %v1828_v46, %v2225_v12  ;;  %v519_v12 = vsel %vm175_vm2, %v509_v54, 0.0 }
 0x408   :  { %1839 = vrcp.f32 %v970_v25  ;;  %v471_v8 = vmul.f32 %v1830_v58, %v2214_v56  ;;  %v520_v63 = vadd.f32 %v519_v12, %v518_v43  ;;  %v523_v40 = vsel %vm175_vm2, %v511_v15, 0.0 }
 0x409   :  { %v1832_v1 = vpop.eup %1831  ;;  %v1027_v41 = vmul.f32 %v2167_v6, %v982_v48 }
 0x40a   :  { %v1834_v28 = vpop.eup %1833  ;;  %v978_v60 = vmul.f32 %v1832_v1, %v2229_v21  ;;  %v1034_v21 = vsel %vm175_vm2, %v1026_v19, 0.0  ;;  %v512_v9 = vmul.f32 %v2264_v7, %v471_v8  ;;  %v1020_v1 = vpop.permute.xlu1 %1019 }
 0x40b   :  { %v984_v36 = vmul.f32 %v1834_v28, %v2234_v27  ;;  %v973_v47 = vpop.xlane.xlu0 %972  ;;  %v521_v27 = vsel %vm175_vm2, %v510_v34, 0.0  ;;  %v1036_v37 = vsel %vm175_vm2, %v1027_v41, 0.0 }
 0x40c   :  { %v1025_v44 = vmul.f32 %v2159_v0, %v978_v60  ;;  %1841 = vrcp.f32 %v973_v47  ;;  %v522_v14 = vadd.f32 %v521_v27, %v520_v63  ;;  %v525_v46 = vsel %vm175_vm2, %v512_v9, 0.0 }
 0x40d   :  { %v1028_v2 = vmul.f32 %v2171_v52, %v984_v36 }
 0x40e   :  { %v1836_v61 = vpop.eup %1835  ;;  %v1033_v56 = vsel %vm175_vm2, %v1025_v44, 0.0  ;;  %v524_v38 = vadd.f32 %v523_v40, %v522_v14  ;;  %v1024_v47 = vpop.permute.xlu1 %1023 }
 0x40f   :  { %v1838_v59 = vpop.eup %1837  ;;  %v1035_v62 = vadd.f32 %v1034_v21, %v1033_v56  ;;  %v986_v6 = vmul.f32 %v1836_v61, %v2241_v55  ;;  %v976_v0 = vpop.xlane.xlu0 %975  ;;  %v1038_v53 = vsel %vm175_vm2, %v1028_v2, 0.0 }
 0x410   :  { %1843 = vrcp.f32 %v976_v0  ;;  %v473_v7 = vmul.f32 %v1838_v59, %v2223_v45  ;;  %v526_v3 = vadd.f32 %v525_v46, %v524_v38 }
 0x411   :  { %v1037_v31 = vadd.f32 %v1036_v37, %v1035_v62  ;;  %v1029_v52 = vmul.f32 %v2175_v10, %v986_v6  ;;  %v1870_v6 = vmov 1966171168  }
 0x412   :  { %v1840_v11 = vpop.eup %1839  ;;  %v588_v0 = vunpack.c.l.s4 %v1870_v6 }
 0x413   :  { %v988_v55 = vmul.f32 %v1840_v11, %v2245_v57  ;;  %v505_v58 = vpop.permute.xlu0 %504  ;;  %v1039_v54 = vadd.f32 %v1038_v53, %v1037_v31  ;;  %v1040_v45 = vsel %vm175_vm2, %v1029_v52, 0.0 }
 0x414   :  { %v513_v25 = vmul.f32 %v505_v58, %v473_v7 }
 0x415   :  { %v1030_v13 = vmul.f32 %v2260_v50, %v988_v55  ;;  %v1041_v19 = vadd.f32 %v1040_v45, %v1039_v54 }
 0x416   :  { %v1842_v48 = vpop.eup %1841  ;;  %v527_v5 = vsel %vm175_vm2, %v513_v25, 0.0 }
 0x417   :  { %v990_v51 = vmul.f32 %v1842_v48, %v2249_v32  ;;  %v528_v28 = vadd.f32 %v527_v5, %v526_v3  ;;  %v1042_v10 = vsel %vm175_vm2, %v1030_v13, 0.0 }
 0x418   :  { %v1043_v26 = vadd.f32 %v1042_v10, %v1041_v19 }
 0x419   :  { %v1031_v57 = vmul.f32 %v1020_v1, %v990_v51  ;;  %v539_v60 = vrot.slane %v528_v28, %v2024_v30  ;;  %v532_v8 = vrot.slane %v528_v28, %v2016_v24  ;;  %v546_v32 = vrot.slane %v528_v28, %v2013_v23 }
 0x41a   :  { %v1844_v34 = vpop.eup %1843  ;;  %v553_v43 = vrot.slane %v528_v28, %v2021_v29  ;;  %v567_v27 = vrot.slane %v528_v28, %v2035_v39 }
 0x41b   :  { %v1044_v50 = vsel %vm175_vm2, %v1031_v57, 0.0  ;;  %v992_v36 = vmul.f32 %v1844_v34, %v2253_v33  ;;  %541 = vbcast.lane.b32.xlu1 %v539_v60, 256  ;;  %534 = vbcast.lane.b32.xlu0 %v532_v8, 256  ;;  %v560_v33 = vrot.slane %v528_v28, %v2031_v35 }
 0x41c   :  { %v1045_v41 = vadd.f32 %v1044_v50, %v1043_v26 }
 0x41d   :  { %v1032_v12 = vmul.f32 %v1024_v47, %v992_v36 }
 0x41f   :  { %v1046_v44 = vsel %vm175_vm2, %v1032_v12, 0.0  ;;  %548 = vbcast.lane.b32.xlu0 %v546_v32, 256 }
 0x420   :  { %v1047_v15 = vadd.f32 %v1046_v44, %v1045_v41 }
 0x422   :  { %v1058_v61 = vrot.slane %v1047_v15, %v2024_v30  ;;  %v1065_v21 = vrot.slane %v1047_v15, %v2013_v23  ;;  %v1051_v56 = vrot.slane %v1047_v15, %v2016_v24  ;;  %v1072_v9 = vrot.slane %v1047_v15, %v2021_v29 }
 0x423   :  { %555 = vbcast.lane.b32.xlu0 %v553_v43, 256  ;;  %v1079_v59 = vrot.slane %v1047_v15, %v2031_v35  ;;  %v574_v30 = vrot.slane %v528_v28, %v2042_v42  ;;  %v1086_v62 = vrot.slane %v1047_v15, %v2035_v39  ;;  %v581_v23 = vrot.slane %v528_v28, %v2055_v49  ;;  %v86_v39 = vld [vmem:[%s2449_s6] sm:$0xff] }
 0x424   :  { %1060 = vbcast.lane.b32.xlu1 %v1058_v61, 256  ;;  %v1093_v2 = vrot.slane %v1047_v15, %v2042_v42  ;;  %v1100_v29 = vrot.slane %v1047_v15, %v2055_v49  ;;  %v589_v35 = vunpack.c.0.s8 %v588_v0  ;;  %v586_v14 = vcombine.high %v86_v39, %v86_v39 }
 0x426   :  { %v592_v63 = vsub.s32 %v589_v35, %v2010_v22 }
 0x427   :  { %562 = vbcast.lane.b32.xlu0 %v560_v33, 256 }
 0x428   :  { %1067 = vbcast.lane.b32.xlu1 %v1065_v21, 256  ;;  %v593_v37 = vrot.slane %v86_v39, %v592_v63  ;;  %v600_v53 = vrot.slane %v586_v14, %v592_v63 }
 0x42a   :  { %v601_v40 = vcombine.high %v593_v37, %v593_v37  ;;  %v609_v46 = vrot.slane %v593_v37, %v592_v63  ;;  %v602_v38 = vcombine.high %v600_v53, %v600_v53  ;;  %v616_v13 = vrot.slane %v600_v53, %v592_v63 }
 0x42b   :  { %1053 = vbcast.lane.b32.xlu0 %v1051_v56, 256 }
 0x42c   :  { %1074 = vbcast.lane.b32.xlu1 %v1072_v9, 256  ;;  %v623_v11 = vrot.slane %v601_v40, %v592_v63  ;;  %v631_v49 = vcombine.high %v609_v46, %v609_v46  ;;  %v638_v22 = vrot.slane %v609_v46, %v2016_v24  ;;  %v630_v1 = vrot.slane %v602_v38, %v592_v63 }
 0x42d   :  { %v654_v10 = vrot.slane %v616_v13, %v2016_v24  ;;  %v632_v34 = vcombine.high %v616_v13, %v616_v13 }
 0x42e   :  { %v642_v52 = vrot.slane %v623_v11, %v2016_v24  ;;  %v633_v58 = vcombine.high %v623_v11, %v623_v11  ;;  %v646_v25 = vrot.slane %v631_v49, %v2016_v24  ;;  %v658_v8 = vrot.slane %v630_v1, %v2016_v24 }
 0x42f   :  { %569 = vbcast.lane.b32.xlu0 %v567_v27, 256  ;;  %v662_v56 = vrot.slane %v632_v34, %v2016_v24 }
 0x430   :  { %1081 = vbcast.lane.b32.xlu1 %v1079_v59, 256  ;;  %v650_v45 = vrot.slane %v633_v58, %v2016_v24 }
 0x433   :  { %576 = vbcast.lane.b32.xlu0 %v574_v30, 256 }
 0x434   :  { %1088 = vbcast.lane.b32.xlu1 %v1086_v62, 256  ;;  %v634_v62 = vcombine.high %v630_v1, %v630_v1 }
 0x436   :  { %v666_v14 = vrot.slane %v634_v62, %v2016_v24 }
 0x437   :  { %583 = vbcast.lane.b32.xlu0 %v581_v23, 256 }
 0x438   :  { %1095 = vbcast.lane.b32.xlu1 %v1093_v2, 256 }
 0x43c   :  { %1102 = vbcast.lane.b32.xlu1 %v1100_v29, 256 }
 0x48d   :  { %v535_v31 = vpop.permute.xlu0 %534  ;;  %v542_v7 = vpop.permute.xlu1 %541 }
 0x48e   :  { %v676_v3 = vmul.f32 %v642_v52, %v542_v7  ;;  %v675_v5 = vmul.f32 %v638_v22, %v535_v31 }
 0x490   :  { %v684_v57 = vsel %vm175_vm2, %v676_v3, 0.0  ;;  %v683_v50 = vsel %vm175_vm2, %v675_v5, 0.0 }
 0x491   :  { %v549_v42 = vpop.permute.xlu0 %548  ;;  %v685_v43 = vadd.f32 %v684_v57, %v683_v50 }
 0x492   :  { %v677_v28 = vmul.f32 %v646_v25, %v549_v42 }
 0x494   :  { %v686_v32 = vsel %vm175_vm2, %v677_v28, 0.0 }
 0x495   :  { %v556_v55 = vpop.permute.xlu0 %555  ;;  %v687_v23 = vadd.f32 %v686_v32, %v685_v43 }
 0x496   :  { %v1061_v54 = vpop.permute.xlu1 %1060  ;;  %v678_v36 = vmul.f32 %v650_v45, %v556_v55 }
 0x497   :  { %v1105_v19 = vmul.f32 %v1061_v54, %v642_v52 }
 0x498   :  { %v688_v9 = vsel %vm175_vm2, %v678_v36, 0.0 }
 0x499   :  { %v563_v48 = vpop.permute.xlu0 %562  ;;  %v1113_v41 = vsel %vm175_vm2, %v1105_v19, 0.0  ;;  %v689_v0 = vadd.f32 %v688_v9, %v687_v23 }
 0x49a   :  { %v1068_v51 = vpop.permute.xlu1 %1067  ;;  %v679_v44 = vmul.f32 %v654_v10, %v563_v48 }
 0x49b   :  { %v1106_v47 = vmul.f32 %v1068_v51, %v646_v25 }
 0x49c   :  { %v690_v6 = vsel %vm175_vm2, %v679_v44, 0.0 }
 0x49d   :  { %v1054_v60 = vpop.permute.xlu0 %1053  ;;  %v1115_v27 = vsel %vm175_vm2, %v1106_v47, 0.0  ;;  %v691_v11 = vadd.f32 %v690_v6, %v689_v0 }
 0x49e   :  { %v1104_v26 = vmul.f32 %v1054_v60, %v638_v22  ;;  %v1075_v12 = vpop.permute.xlu1 %1074 }
 0x49f   :  { %v1107_v33 = vmul.f32 %v1075_v12, %v650_v45 }
 0x4a0   :  { %v1112_v15 = vsel %vm175_vm2, %v1104_v26, 0.0 }
 0x4a1   :  { %v1114_v61 = vadd.f32 %v1113_v41, %v1112_v15  ;;  %v570_v21 = vpop.permute.xlu0 %569  ;;  %v1117_v35 = vsel %vm175_vm2, %v1107_v33, 0.0 }
 0x4a2   :  { %v680_v59 = vmul.f32 %v658_v8, %v570_v21  ;;  %v1082_v30 = vpop.permute.xlu1 %1081 }
 0x4a3   :  { %v1116_v2 = vadd.f32 %v1115_v27, %v1114_v61  ;;  %v1108_v29 = vmul.f32 %v1082_v30, %v654_v10  ;;  %v1656_v27 = vld [vmem:[%s2451_s8] ss:$0 sm:$0xff] }
 0x4a4   :  { %v692_v37 = vsel %vm175_vm2, %v680_v59, 0.0 }
 0x4a5   :  { %v577_v63 = vpop.permute.xlu0 %576  ;;  %v1118_v39 = vadd.f32 %v1117_v35, %v1116_v2  ;;  %v1119_v42 = vsel %vm175_vm2, %v1108_v29, 0.0  ;;  %v693_v53 = vadd.f32 %v692_v37, %v691_v11 }
 0x4a6   :  { %v681_v40 = vmul.f32 %v662_v56, %v577_v63  ;;  %v1089_v31 = vpop.permute.xlu1 %1088 }
 0x4a7   :  { %v1109_v7 = vmul.f32 %v1089_v31, %v658_v8  ;;  %v1120_v52 = vadd.f32 %v1119_v42, %v1118_v39 }
 0x4a8   :  { %v694_v46 = vsel %vm175_vm2, %v681_v40, 0.0 }
 0x4a9   :  { %v584_v49 = vpop.permute.xlu0 %583  ;;  %v695_v22 = vadd.f32 %v694_v46, %v693_v53  ;;  %v1121_v58 = vsel %vm175_vm2, %v1109_v7, 0.0  ;;  %v1214_v46 = vld [vmem:[%s2452_s11] sm:$0xff] }
 0x4aa   :  { %v682_v55 = vmul.f32 %v666_v14, %v584_v49  ;;  %v1096_v38 = vpop.permute.xlu1 %1095  ;;  %v1122_v48 = vadd.f32 %v1121_v58, %v1120_v52  ;;  %1723 = vmatprep.subr.mxu0 %v1214_v46 }
 0x4ab   :  { %v1110_v54 = vmul.f32 %v1096_v38, %v662_v56  ;;  %v1655_v56 = vld [vmem:[%s2450_s7] ss:$0 sm:$0xff]  ;;  %1724 = vmatpush3.msra.mxu0 %v1214_v46 }
 0x4ac   :  { %v696_v25 = vsel %vm175_vm2, %v682_v55, 0.0 }
 0x4ad   :  { %v697_v13 = vadd.f32 %v696_v25, %v695_v22  ;;  %v1123_v3 = vsel %vm175_vm2, %v1110_v54, 0.0  ;;  %v2377_v54 = vld [vmem:[%s2453_s9] ss:$0 sm:$0xff] }
 0x4ae   :  { %v1103_v1 = vpop.permute.xlu1 %1102  ;;  %v1124_v51 = vadd.f32 %v1123_v3, %v1122_v48 }
 0x4af   :  { %v1111_v5 = vmul.f32 %v1103_v1, %v666_v14  ;;  %v1127_v45 = vadd.f32 %v697_v13, %v1984_v18  ;;  %v2382_v13 = vld [vmem:[%s2454_s10] ss:$0 sm:$0xff] }
 0x4b1   :  { %v1125_v28 = vsel %vm175_vm2, %v1111_v5, 0.0  ;;  %v1129_v19 = vsel %vm175_vm2, %v1127_v45, 0.0 }
 0x4b2   :  { %v1126_v10 = vadd.f32 %v1125_v28, %v1124_v51  ;;  %1130 = vadd.xlane.f32.xlu0 %v1129_v19  ;;  %v1865_v28 = vld [vmem:[%s2444_s1] sm:$0xff] }
 0x4b3   :  { %v1350_v19 = vld [vmem:[%s2455_s12] sm:$0xff] }
 0x4b4   :  { %v1128_v57 = vadd.f32 %v1126_v10, %v2000_v20  ;;  %v1351_v10 = vld [vmem:[%s2455_s12 + $0x8] sm:$0xff] }
 0x4b6   :  { %v1132_v60 = vsel %vm175_vm2, %v1128_v57, 0.0 }
 0x4b7   :  { %1133 = vadd.xlane.f32.xlu1 %v1132_v60  ;;  %v1352_v60 = vld [vmem:[%s2455_s12 + $0x10] sm:$0xff] }
 0x53f   :  { %v1131_v8 = vpop.xlane.xlu0 %1130 }
 0x540   :  { %v1136_v34 = vmul.f32 0.125, %v1131_v8  ;;  %v1353_v8 = vld [vmem:[%s2455_s12 + $0x18] sm:$0xff] }
 0x542   :  { %v1138_v50 = vsub.f32 %v1127_v45, %v1136_v34  ;;  %v1761_v34 = vpack.c.bf16 %v1353_v8, %v1352_v60 }
 0x544   :  { %v1134_v36 = vpop.xlane.xlu1 %1133  ;;  %v1140_v47 = vmul.f32 %v1138_v50, %v1138_v50 }
 0x545   :  { %v1137_v26 = vmul.f32 0.125, %v1134_v36 }
 0x546   :  { %v1142_v18 = vsel %vm175_vm2, %v1140_v47, 0.0 }
 0x547   :  { %v1139_v12 = vsub.f32 %v1128_v57, %v1137_v26  ;;  %1143 = vadd.xlane.f32.xlu0 %v1142_v18  ;;  %v1757_v57 = vpack.c.bf16 %v1351_v10, %v1350_v19 }
 0x549   :  { %v1141_v32 = vmul.f32 %v1139_v12, %v1139_v12  ;;  %1758 = vmatprep.subr.bf16.mxu1 %v1757_v57 }
 0x54a   :  { %1760 = vmatpush3.bf16.msra.mxu1 %v1757_v57 }
 0x54b   :  { %v1145_v41 = vsel %vm175_vm2, %v1141_v32, 0.0  ;;  %1762 = vmatprep.subr.bf16.mxu1 %v1761_v34 }
 0x54c   :  { %1146 = vadd.xlane.f32.xlu0 %v1145_v41 }
 0x54e   :  { %1764 = vmatpush3.bf16.msra.mxu1 %v1761_v34 }
 0x5d4   :  { %v1144_v44 = vpop.xlane.xlu0 %1143 }
 0x5d5   :  { %v1148_v15 = vmul.f32 0.125, %v1144_v44 }
 0x5d7   :  { %v1150_v20 = vadd.f32 1e-05, %v1148_v15 }
 0x5d9   :  { %1845 = vrsqrt.f32 %v1150_v20  ;;  %v1147_v43 = vpop.xlane.xlu0 %1146 }
 0x5da   :  { %v1149_v61 = vmul.f32 0.125, %v1147_v43 }
 0x5dc   :  { %v1151_v33 = vadd.f32 1e-05, %v1149_v61 }
 0x5de   :  { %1847 = vrsqrt.f32 %v1151_v33 }
 0x5e3   :  { %v1846_v21 = vpop.eup %1845 }
 0x5e4   :  { %v1154_v9 = vmul.f32 %v1846_v21, %v1138_v50 }
 0x5e6   :  { %v1162_v59 = vmul.f32 %v1655_v56, %v1154_v9 }
 0x5e8   :  { %v1848_v30 = vpop.eup %1847  ;;  %v1170_v62 = vadd.f32 %v1656_v27, %v1162_v59 }
 0x5e9   :  { %v1155_v23 = vmul.f32 %v1848_v30, %v1139_v12 }
 0x5ea   :  { %v1172_v2 = vsel %vm175_vm2, %v1170_v62, 0.0 }
 0x5eb   :  { %1173 = vadd.xlane.f32.xlu1 %v1172_v2  ;;  %v1163_v29 = vmul.f32 %v1655_v56, %v1155_v23 }
 0x5ed   :  { %v1171_v6 = vadd.f32 %v1656_v27, %v1163_v29 }
 0x5ef   :  { %v1175_v0 = vsel %vm175_vm2, %v1171_v6, 0.0 }
 0x5f0   :  { %1176 = vadd.xlane.f32.xlu0 %v1175_v0 }
 0x678   :  { %v1174_v35 = vpop.xlane.xlu1 %1173 }
 0x679   :  { %v1178_v63 = vmul.f32 0.125, %v1174_v35 }
 0x67b   :  { %v1180_v39 = vsub.f32 %v1170_v62, %v1178_v63 }
 0x67d   :  { %v1177_v37 = vpop.xlane.xlu0 %1176  ;;  %v1182_v40 = vmul.f32 %v1180_v39, %v1180_v39 }
 0x67e   :  { %v1179_v31 = vmul.f32 0.125, %v1177_v37 }
 0x67f   :  { %v1184_v14 = vsel %vm175_vm2, %v1182_v40, 0.0 }
 0x680   :  { %v1181_v11 = vsub.f32 %v1171_v6, %v1179_v31  ;;  %1185 = vadd.xlane.f32.xlu1 %v1184_v14 }
 0x682   :  { %v1183_v42 = vmul.f32 %v1181_v11, %v1181_v11 }
 0x684   :  { %v1187_v7 = vsel %vm175_vm2, %v1183_v42, 0.0 }
 0x685   :  { %1188 = vadd.xlane.f32.xlu0 %v1187_v7 }
 0x70d   :  { %v1186_v53 = vpop.xlane.xlu1 %1185 }
 0x70e   :  { %v1190_v49 = vmul.f32 0.125, %v1186_v53 }
 0x710   :  { %v1192_v52 = vadd.f32 1e-05, %v1190_v49 }
 0x712   :  { %1849 = vrsqrt.f32 %v1192_v52  ;;  %v1189_v55 = vpop.xlane.xlu0 %1188 }
 0x713   :  { %v1191_v38 = vmul.f32 0.125, %v1189_v55 }
 0x715   :  { %v1193_v22 = vadd.f32 1e-05, %v1191_v38 }
 0x717   :  { %1851 = vrsqrt.f32 %v1193_v22 }
 0x71c   :  { %v1850_v58 = vpop.eup %1849 }
 0x71d   :  { %v1196_v25 = vmul.f32 %v1850_v58, %v1180_v39 }
 0x71f   :  { %v1204_v3 = vmul.f32 %v2377_v54, %v1196_v25 }
 0x721   :  { %v1852_v48 = vpop.eup %1851  ;;  %v2386_v1 = vadd.f32 %v2382_v13, %v1204_v3 }
 0x722   :  { %v1197_v5 = vmul.f32 %v1852_v48, %v1181_v11 }
 0x723   :  { %1725 = vmatprep.mubr.msk.f32.mxu0 %vm175_vm2, %v2386_v1 }
 0x724   :  { %v1205_v45 = vmul.f32 %v2377_v54, %v1197_v5 }
 0x726   :  { %v2392_v51 = vadd.f32 %v2382_v13, %v1205_v45 }
 0x728   :  { %1726 = vmatmul.mubr.msk.f32.vlgmr.msra.gmra.mrb[2].mxu0 %vm175_vm2, %v2392_v51 }
 0x729   :  { %1743 = vmatprep.mubr.msk.f32.mxu0 %vm91_vm0, %v1865_v28 }
 0x7fb   :  { %v1727_v50 = vpop.f32.mrb[2].mxu0 }
 0x7fc   :  { %v1299_v36 = vmul.f32 0.70710677, %v1727_v50  ;;  %v1287_v47 = vpop.f32.mrb[3].mxu0  ;;  %v1297_v28 = vmul.f32 0.5, %v1727_v50 }
 0x7fd   :  { %v1298_v26 = vmul.f32 0.70710677, %v1287_v47  ;;  %v1296_v5 = vmul.f32 0.5, %v1287_v47 }
 0x7fe   :  { %v1301_v18 = vand.u32 2147483647, %v1299_v36  ;;  %vm1341_vm3 = vcmp.ge.f32.partialorder %v1299_v36, 0.0 }
 0x7ff   :  { %v1300_v12 = vand.u32 2147483647, %v1298_v26  ;;  %vm1340_vm4 = vcmp.ge.f32.partialorder %v1298_v26, 0.0 }
 0x800   :  { %v1303_v32 = vmul.f32 0.3275911, %v1301_v18  ;;  %v1329_v20 = vsub.f32 0.0, %v1301_v18 }
 0x801   :  { %v1302_v41 = vmul.f32 0.3275911, %v1300_v12  ;;  %v1328_v43 = vsub.f32 0.0, %v1300_v12 }
 0x802   :  { %v1305_v44 = vadd.f32 1.0, %v1303_v32  ;;  %v1331_v33 = vmul.f32 %v1329_v20, %v1301_v18 }
 0x803   :  { %v1304_v15 = vadd.f32 1.0, %v1302_v41  ;;  %v1330_v9 = vmul.f32 %v1328_v43, %v1300_v12 }
 0x804   :  { %1853 = vrcp.f32 %v1305_v44  ;;  %v1334_v30 = vmul.f32 1.442695, %v1331_v33 }
 0x805   :  { %1855 = vrcp.f32 %v1304_v15  ;;  %v1332_v2 = vmul.f32 1.442695, %v1330_v9 }
 0x806   :  { %1857 = vpow2.f32 %v1334_v30 }
 0x807   :  { %1859 = vpow2.f32 %v1332_v2 }
 0x80e   :  { %v1854_v61 = vpop.eup %1853 }
 0x80f   :  { %v1856_v21 = vpop.eup %1855  ;;  %v1311_v56 = vmul.f32 1.0614054, %v1854_v61 }
 0x810   :  { %v1310_v27 = vmul.f32 1.0614054, %v1856_v21  ;;  %v1858_v7 = vpop.eup %1857 }
 0x811   :  { %v1313_v59 = vadd.f32 -1.4531521, %v1311_v56  ;;  %v1860_v53 = vpop.eup %1859 }
 0x812   :  { %v1312_v62 = vadd.f32 -1.4531521, %v1310_v27 }
 0x813   :  { %v1315_v23 = vmul.f32 %v1854_v61, %v1313_v59 }
 0x814   :  { %v1314_v29 = vmul.f32 %v1856_v21, %v1312_v62 }
 0x815   :  { %v1317_v6 = vadd.f32 1.4214138, %v1315_v23 }
 0x816   :  { %v1316_v0 = vadd.f32 1.4214138, %v1314_v29 }
 0x817   :  { %v1319_v35 = vmul.f32 %v1854_v61, %v1317_v6 }
 0x818   :  { %v1318_v63 = vmul.f32 %v1856_v21, %v1316_v0  ;;  %v1866_v0 = vld [vmem:[%s2444_s1 + $0x8] sm:$0xff] }
 0x819   :  { %v1321_v39 = vadd.f32 -0.28449672, %v1319_v35  ;;  %v1871_v35 = vmov 0.0|0.0  }
 0x81a   :  { %v1320_v37 = vadd.f32 -0.28449672, %v1318_v63 }
 0x81b   :  { %v1323_v40 = vmul.f32 %v1854_v61, %v1321_v39 }
 0x81c   :  { %v1322_v31 = vmul.f32 %v1856_v21, %v1320_v37 }
 0x81d   :  { %v1325_v14 = vadd.f32 0.2548296, %v1323_v40 }
 0x81e   :  { %v1324_v11 = vadd.f32 0.2548296, %v1322_v31 }
 0x81f   :  { %v1327_v42 = vmul.f32 %v1854_v61, %v1325_v14 }
 0x820   :  { %v1326_v46 = vmul.f32 %v1856_v21, %v1324_v11 }
 0x821   :  { %v1337_v49 = vmul.f32 %v1858_v7, %v1327_v42  ;;  %v1549_v7 = vld [vmem:[%s2457_s13] sm:$0x1] }
 0x822   :  { %v1336_v52 = vmul.f32 %v1860_v53, %v1326_v46 }
 0x823   :  { %v1339_v55 = vsub.f32 1.0, %v1337_v49 }
 0x824   :  { %v1338_v38 = vsub.f32 1.0, %v1336_v52 }
 0x825   :  { %v1343_v22 = vsub.f32 0.0, %v1339_v55 }
 0x826   :  { %v1342_v58 = vsub.f32 0.0, %v1338_v38 }
 0x827   :  { %v1345_v25 = vsel %vm1341_vm3, %v1339_v55, %v1343_v22 }
 0x828   :  { %v1347_v3 = vadd.f32 1.0, %v1345_v25  ;;  %v1344_v48 = vsel %vm1340_vm4, %v1338_v38, %v1342_v58 }
 0x829   :  { %v1346_v45 = vadd.f32 1.0, %v1344_v48 }
 0x82a   :  { %v1349_v10 = vmul.f32 %v1347_v3, %v1297_v28 }
 0x82b   :  { %v1348_v19 = vmul.f32 %v1346_v45, %v1296_v5 }
 0x82d   :  { %1736 = vmatprep.mubr.msk.f32.mxu1 %vm1354_vm5, %v1348_v19 }
 0x82e   :  { %1737 = vmatmul.mubr.msk.f32.vlgmr.msra.gmra.mrb[8].mxu1 %vm1354_vm5, %v1349_v10 }
 0x901   :  { %v1738_v57 = vpop.f32.mrb[8].mxu1 }
 0x902   :  { %v1437_v60 = vadd.f32 %v1738_v57, %v2392_v51  ;;  %v1427_v8 = vpop.f32.mrb[9].mxu1 }
 0x903   :  { %v1436_v34 = vadd.f32 %v1427_v8, %v2386_v1 }
 0x904   :  { %v1441_v36 = vsel %vm175_vm2, %v1437_v60, 0.0 }
 0x905   :  { %1442 = vadd.xlane.f32.xlu0 %v1441_v36  ;;  %v1438_v26 = vsel %vm175_vm2, %v1436_v34, 0.0 }
 0x906   :  { %1439 = vadd.xlane.f32.xlu1 %v1438_v26 }
 0x992   :  { %v1443_v47 = vpop.xlane.xlu0 %1442 }
 0x993   :  { %v1445_v18 = vmul.f32 0.125, %v1443_v47  ;;  %v1440_v50 = vpop.xlane.xlu1 %1439 }
 0x994   :  { %v1444_v12 = vmul.f32 0.125, %v1440_v50 }
 0x995   :  { %v1447_v32 = vsub.f32 %v1437_v60, %v1445_v18 }
 0x996   :  { %v1446_v41 = vsub.f32 %v1436_v34, %v1444_v12 }
 0x997   :  { %v1449_v44 = vmul.f32 %v1447_v32, %v1447_v32 }
 0x998   :  { %v1448_v15 = vmul.f32 %v1446_v41, %v1446_v41 }
 0x999   :  { %v1453_v20 = vsel %vm175_vm2, %v1449_v44, 0.0 }
 0x99a   :  { %1454 = vadd.xlane.f32.xlu0 %v1453_v20  ;;  %v1450_v51 = vsel %vm175_vm2, %v1448_v15, 0.0 }
 0x99b   :  { %1451 = vadd.xlane.f32.xlu1 %v1450_v51 }
 0xa27   :  { %v1455_v1 = vpop.xlane.xlu0 %1454 }
 0xa28   :  { %v1457_v43 = vmul.f32 0.125, %v1455_v1  ;;  %v1452_v61 = vpop.xlane.xlu1 %1451 }
 0xa29   :  { %v1456_v33 = vmul.f32 0.125, %v1452_v61 }
 0xa2a   :  { %v1459_v21 = vadd.f32 1e-05, %v1457_v43 }
 0xa2b   :  { %v1458_v56 = vadd.f32 1e-05, %v1456_v33 }
 0xa2c   :  { %1861 = vrsqrt.f32 %v1459_v21 }
 0xa2d   :  { %1863 = vrsqrt.f32 %v1458_v56 }
 0xa36   :  { %v1862_v9 = vpop.eup %1861 }
 0xa37   :  { %v1864_v27 = vpop.eup %1863  ;;  %v1463_v59 = vmul.f32 %v1862_v9, %v1447_v32 }
 0xa38   :  { %v1462_v30 = vmul.f32 %v1864_v27, %v1446_v41 }
 0xa39   :  { %v1465_v62 = vmul.f32 %v2377_v54, %v1463_v59 }
 0xa3a   :  { %v1464_v23 = vmul.f32 %v2377_v54, %v1462_v30  ;;  %v20_v54 = vstv %s2456_s14 }
 0xa3b   :  { %v1467_v2 = vadd.f32 %v2382_v13, %v1465_v62  ;;  %21 = vst [vmem:[#allocation2] sm:$0x1] %v20_v54 }
 0xa3c   :  { %v1466_v29 = vadd.f32 %v2382_v13, %v1464_v23 }
 0xa3e   :  { %v1765_v6 = vpack.c.bf16 %v1467_v2, %v1466_v29 }
 0xa40   :  { %1766 = vmatprep.subr.bf16.mxu0 %v1765_v6 }
 0xa41   :  { %1768 = vmatpush3.bf16.msra.mxu0 %v1765_v6 }
 0xa42   :  { %1769 = vmatprep.subr.bf16.mxu0 %v1871_v35  ;;  %v1550_v13 = vld [vmem:[#allocation2] sm:$0x1] }
 0xa43   :  { %1553 = vperm.xlu1 %1779, %v1550_v13  }
 0xa44   :  { %1744 = vmatmul.mubr.msk.f32.vlgmr.msra.gmra.mrb[4].mxu0 %vm91_vm0, %v1866_v0 }
 0xa45   :  { %1750 = vmatprep.mubr.msk.f32.mxu0 %vm1869_vm1, %v1868_v4 }
 0xac2   :  { %v1554_v46 = vpop.permute.xlu1 %1553 }
 0xb17   :  { %v1745_v63 = vpop.f32.mrb[4].mxu0 }
 0xb18   :  { %v1544_v39 = vadd.f32 %v1745_v63, %v1979_v16  ;;  %v1546_v37 = vsub.f32 %v1467_v2, %v1745_v63  ;;  %v1534_v40 = vpop.f32.mrb[5].mxu0  ;;  %v1559_v16 = vrot.slane %v1554_v46, %v2016_v24 }
 0xb19   :  { %v1543_v31 = vadd.f32 %v1534_v40, %v1981_v17  ;;  %v1545_v14 = vsub.f32 %v1466_v29, %v1534_v40 }
 0xb1a   :  { %v1548_v11 = vadd.f32 %v1546_v37, %v1544_v39 }
 0xb1b   :  { %v1547_v42 = vadd.f32 %v1545_v14, %v1543_v31 }
 0xb1d   :  { %v1770_v4 = vpack.c.bf16 %v1548_v11, %v1547_v42 }
 0xb1f   :  { %1772 = vmatpush3.bf16.xpose.msk.msra.mxu0 %vm1771_vm6, %v1770_v4 }
 0xb26   :  { %1751 = vmatmul.mubr.msk.f32.vlgmr.msra.gmra.mrb[6].mxu0 %vm175_vm2, %v1549_v7 }
 0xbf9   :  { %v1635_v53 = vpop.f32.mrb[6].mxu0 }
 0xbfa   :  { %v1636_v17 = vadd.f32 %v1635_v53, %v1559_v16  ;;  %v1752_v49 = vpop.f32.mrb[7].mxu0 }
 0xbfc   :  { %1640 = vst.msk [vmem:[%s2458_s15] sm:$0x1] %vm1639_vm7, %v1636_v17 }

</bundles_post_ra>
